<compile_context>
chip_gen: v6e
topology: v6e:2x2x1
jax: 0.10.0
libtpu: 0.0.40
codegen_flags: <defaults>
</compile_context>

<pallas_src>
import itertools

import jax
import jax.numpy as jnp
from jax.experimental import pallas as pl
from jax.experimental.pallas import tpu as pltpu


def make_afm_kernel(num_fields: int, embed_dim: int, att_factor: int, mxu_dtype):
    pairs = list(itertools.combinations(range(num_fields), 2))
    P = len(pairs)
    D = embed_dim
    A = att_factor

    def afm_kernel(x_ref, wblk_ref, brep_ref, hblk_ref, o_ref):
        x = x_ref[...]            # (F*D, TB)  batch on lanes
        w_blk = wblk_ref[...]     # (P*A + P, P*D): rows [0,P*A) = blockdiag(W^T),
                                  #                 rows [P*A,...) = blockdiag(p^T)
        b_rep = brep_ref[...]     # (P*A, 1)   bias tiled per pair
        h_blk = hblk_ref[...]     # (P, P*A)   blockdiag(h^T)

        # Pairwise products, stacked on sublanes (pair-major): (P*D, TB).
        # Static, 8-aligned sublane slices of the already-loaded x block.
        bi = jnp.concatenate(
            [x[i * D:(i + 1) * D, :] * x[j * D:(j + 1) * D, :]
             for (i, j) in pairs],
            axis=0,
        )

        # One fused MXU pass over all pairs AND the folded p-projection.
        z = jnp.dot(w_blk.astype(mxu_dtype), bi.astype(mxu_dtype),
                    preferred_element_type=jnp.float32)          # (P*A + P, TB)

        att = jnp.maximum(z[:P * A, :] + b_rep, 0.0)             # (P*A, TB)
        proj = z[P * A:, :]                                      # (P, TB)  = bi_p @ p

        # Second fused dot gives logits directly as (P, TB): no relayout needed.
        logits = jnp.dot(h_blk.astype(mxu_dtype), att.astype(mxu_dtype),
                         preferred_element_type=jnp.float32)     # (P, TB)

        # Softmax over pairs (sublane axis), batch stays on lanes.
        # out[b] = sum_p softmax_p[b] * (bi_p[b] @ p)  — exact fold of the final
        # projection into the pair reduction.
        m = jnp.max(logits, axis=0, keepdims=True)               # (1, TB)
        e = jnp.exp(logits - m)                                  # (P, TB)
        den = jnp.sum(e, axis=0, keepdims=True)                  # (1, TB)
        num = jnp.sum(e * proj, axis=0, keepdims=True)           # (1, TB)

        o_ref[...] = (num * pl.reciprocal(den, approx=True)).astype(o_ref.dtype)

    return afm_kernel


def digixnet_forward(x, attention_W, attention_b, projection_h, projection_p,
                     *, block_batch=1024, mxu_dtype=jnp.float32):
    """Pallas implementation of DIGIXNet.forward (== AFMLayer forward, eval)."""
    B, F, D = x.shape
    A = attention_W.shape[1]
    P = F * (F - 1) // 2

    block_batch = min(block_batch, B)
    assert B % block_batch == 0, "batch must be divisible by block_batch"
    assert block_batch % 128 == 0 or block_batch == B, (
        "block_batch should be a multiple of 128 (lane width) or the full batch")
    num_blocks = B // block_batch

    # ---- host-side layout plumbing (weights are tiny; done once) -------------
    # Batch-on-lanes activation layout: (F*D, B).
    x_t = jnp.transpose(x.reshape(B, F * D))                      # (F*D, B)

    # Block-diagonal weights fold all P pairs onto the MXU K axis.
    wa_blk = jnp.kron(jnp.eye(P, dtype=jnp.float32), attention_W.T)         # (P*A, P*D)
    wp_blk = jnp.kron(jnp.eye(P, dtype=jnp.float32), projection_p.reshape(1, D))  # (P, P*D)
    w_blk = jnp.concatenate([wa_blk, wp_blk], axis=0)             # (P*A + P, P*D)
    b_rep = jnp.tile(attention_b.reshape(A, 1), (P, 1))           # (P*A, 1)
    h_blk = jnp.kron(jnp.eye(P, dtype=jnp.float32), projection_h.reshape(1, A))   # (P, P*A)

    kernel = make_afm_kernel(F, D, A, mxu_dtype)

    out = pl.pallas_call(
        kernel,
        out_shape=jax.ShapeDtypeStruct((1, B), jnp.float32),
        grid_spec=pltpu.PrefetchScalarGridSpec(
            num_scalar_prefetch=0,
            grid=(num_blocks,),
            in_specs=[
                pl.BlockSpec((F * D, block_batch), lambda i: (0, i)),   # x (batch on lanes)
                pl.BlockSpec((P * A + P, P * D), lambda i: (0, 0)),     # fused block weights
                pl.BlockSpec((P * A, 1), lambda i: (0, 0)),             # bias (per pair)
                pl.BlockSpec((P, P * A), lambda i: (0, 0)),             # blockdiag(h^T)
            ],
            out_specs=pl.BlockSpec((1, block_batch), lambda i: (0, i)),  # lane-dense output
        ),
        compiler_params=pltpu.CompilerParams(
            dimension_semantics=("parallel",),
        ),
    )(x_t, w_blk, b_rep, h_blk)

    # (1, B) lane row -> (B, 1) column; pure reshape outside the kernel.
    return out.reshape(B, 1)


def afm_reference(x, W, b, h, p):
    """Pure-JAX reference of the AFM forward, for verification."""
    B, F, D = x.shape
    pairs = list(itertools.combinations(range(F), 2))
    bi = jnp.stack([x[:, i, :] * x[:, j, :] for (i, j) in pairs], axis=1)  # (B,P,D)
    att = jnp.maximum(jnp.einsum('bpd,da->bpa', bi, W) + b[0], 0.0)        # (B,P,A)
    logits = jnp.einsum('bpa,ao->bpo', att, h)                             # (B,P,1)
    score = jax.nn.softmax(logits, axis=1)                                 # (B,P,1)
    attn_out = jnp.sum(score * bi, axis=1)                                 # (B,D)
    return attn_out @ p                                                    # (B,1)


if __name__ == "__main__":
    # batch=2048 -> two 1024-column grid steps (even grid for v7x's 2 TCs),
    # num_fields=4 (-> 6 pairs), embed_dim=16, attention_factor=8.
    B, F, D, A = 2048, 4, 16, 8

    key = jax.random.PRNGKey(0)
    kx, kw, kb, kh, kp = jax.random.split(key, 5)

    x = jax.random.normal(kx, (B, F, D), dtype=jnp.float32)
    attention_W = jax.random.normal(kw, (D, A), dtype=jnp.float32) * 0.1
    attention_b = jax.random.normal(kb, (1, A), dtype=jnp.float32) * 0.01
    projection_h = jax.random.normal(kh, (A, 1), dtype=jnp.float32) * 0.1
    projection_p = jax.random.normal(kp, (D, 1), dtype=jnp.float32) * 0.1

    out = digixnet_forward(x, attention_W, attention_b, projection_h,
                           projection_p, block_batch=1024)
    out = jax.block_until_ready(out)

    ref = afm_reference(x, attention_W, attention_b, projection_h, projection_p)
    assert out.shape == (B, 1)
    # Softmax normalization uses the EUP approx reciprocal -> slightly loose tol.
    err = float(jnp.max(jnp.abs(out - ref)))
    assert jnp.allclose(out, ref, atol=5e-3, rtol=5e-3), err

    print("KERNEL_OK")
</pallas_src>

<mosaic_0001>
module attributes {stable_mosaic.version = 11 : i64} {
  func.func @afm_kernel(%arg0: i32, %arg1: memref<64x1024xf32, #tpu.memory_space<vmem>>, %arg2: memref<54x96xf32, #tpu.memory_space<vmem>>, %arg3: memref<48x1xf32, #tpu.memory_space<vmem>>, %arg4: memref<6x48xf32, #tpu.memory_space<vmem>>, %arg5: memref<1x1024xf32, #tpu.memory_space<vmem>>) attributes {dimension_semantics = [#tpu.dimension_semantics<parallel>], iteration_bounds = array<i64: 2>, scalar_prefetch = 0 : i64, scratch_operands = 0 : i64, tpu.core_type = #tpu.core_type<tc>, window_params = [{transform_indices = @transform_0, window_bounds = array<i64: 64, 1024>}, {pipeline_mode = #tpu.pipeline_mode<synchronous>, transform_indices = @transform_1, window_bounds = array<i64: 54, 96>}, {pipeline_mode = #tpu.pipeline_mode<synchronous>, transform_indices = @transform_2, window_bounds = array<i64: 48, 1>}, {pipeline_mode = #tpu.pipeline_mode<synchronous>, transform_indices = @transform_3, window_bounds = array<i64: 6, 48>}, {transform_indices = @transform_4, window_bounds = array<i64: 1, 1024>}]} {
    %c0 = arith.constant 0 : index
    %c0_0 = arith.constant 0 : index
    %0 = vector.load %arg1[%c0, %c0_0] : memref<64x1024xf32, #tpu.memory_space<vmem>>, vector<64x1024xf32>
    %c0_1 = arith.constant 0 : index
    %c0_2 = arith.constant 0 : index
    %1 = vector.load %arg2[%c0_1, %c0_2] : memref<54x96xf32, #tpu.memory_space<vmem>>, vector<54x96xf32>
    %c0_3 = arith.constant 0 : index
    %c0_4 = arith.constant 0 : index
    %2 = vector.load %arg3[%c0_3, %c0_4] : memref<48x1xf32, #tpu.memory_space<vmem>>, vector<48x1xf32>
    %c0_5 = arith.constant 0 : index
    %c0_6 = arith.constant 0 : index
    %3 = vector.load %arg4[%c0_5, %c0_6] : memref<6x48xf32, #tpu.memory_space<vmem>>, vector<6x48xf32>
    %4 = vector.extract_strided_slice %0 {offsets = [0, 0], sizes = [16, 1024], strides = [1, 1]} : vector<64x1024xf32> to vector<16x1024xf32>
    %5 = vector.extract_strided_slice %0 {offsets = [16, 0], sizes = [16, 1024], strides = [1, 1]} : vector<64x1024xf32> to vector<16x1024xf32>
    %6 = arith.mulf %4, %5 : vector<16x1024xf32>
    %7 = vector.extract_strided_slice %0 {offsets = [0, 0], sizes = [16, 1024], strides = [1, 1]} : vector<64x1024xf32> to vector<16x1024xf32>
    %8 = vector.extract_strided_slice %0 {offsets = [32, 0], sizes = [16, 1024], strides = [1, 1]} : vector<64x1024xf32> to vector<16x1024xf32>
    %9 = arith.mulf %7, %8 : vector<16x1024xf32>
    %10 = vector.extract_strided_slice %0 {offsets = [0, 0], sizes = [16, 1024], strides = [1, 1]} : vector<64x1024xf32> to vector<16x1024xf32>
    %11 = vector.extract_strided_slice %0 {offsets = [48, 0], sizes = [16, 1024], strides = [1, 1]} : vector<64x1024xf32> to vector<16x1024xf32>
    %12 = arith.mulf %10, %11 : vector<16x1024xf32>
    %13 = vector.extract_strided_slice %0 {offsets = [16, 0], sizes = [16, 1024], strides = [1, 1]} : vector<64x1024xf32> to vector<16x1024xf32>
    %14 = vector.extract_strided_slice %0 {offsets = [32, 0], sizes = [16, 1024], strides = [1, 1]} : vector<64x1024xf32> to vector<16x1024xf32>
    %15 = arith.mulf %13, %14 : vector<16x1024xf32>
    %16 = vector.extract_strided_slice %0 {offsets = [16, 0], sizes = [16, 1024], strides = [1, 1]} : vector<64x1024xf32> to vector<16x1024xf32>
    %17 = vector.extract_strided_slice %0 {offsets = [48, 0], sizes = [16, 1024], strides = [1, 1]} : vector<64x1024xf32> to vector<16x1024xf32>
    %18 = arith.mulf %16, %17 : vector<16x1024xf32>
    %19 = vector.extract_strided_slice %0 {offsets = [32, 0], sizes = [16, 1024], strides = [1, 1]} : vector<64x1024xf32> to vector<16x1024xf32>
    %20 = vector.extract_strided_slice %0 {offsets = [48, 0], sizes = [16, 1024], strides = [1, 1]} : vector<64x1024xf32> to vector<16x1024xf32>
    %21 = arith.mulf %19, %20 : vector<16x1024xf32>
    %22 = tpu.concatenate %6, %9, %12, %15, %18, %21 in 0 : vector<16x1024xf32>, vector<16x1024xf32>, vector<16x1024xf32>, vector<16x1024xf32>, vector<16x1024xf32>, vector<16x1024xf32> -> vector<96x1024xf32>
    %cst = arith.constant dense<0.000000e+00> : vector<54x1024xf32>
    %23 = tpu.matmul %1, %22, %cst {dimension_numbers = #tpu.dot_dimension_numbers<[1], [0], [0], [1], [0, 0, 1, 1], [], []>} : vector<54x96xf32>, vector<96x1024xf32>, vector<54x1024xf32> -> vector<54x1024xf32>
    %24 = vector.extract_strided_slice %23 {offsets = [0, 0], sizes = [48, 1024], strides = [1, 1]} : vector<54x1024xf32> to vector<48x1024xf32>
    %25 = vector.broadcast %2 : vector<48x1xf32> to vector<48x1024xf32>
    %26 = arith.addf %24, %25 : vector<48x1024xf32>
    %cst_7 = arith.constant 0.000000e+00 : f32
    %27 = vector.broadcast %cst_7 : f32 to vector<48x1024xf32>
    %28 = arith.maximumf %26, %27 : vector<48x1024xf32>
    %29 = vector.extract_strided_slice %23 {offsets = [48, 0], sizes = [6, 1024], strides = [1, 1]} : vector<54x1024xf32> to vector<6x1024xf32>
    %cst_8 = arith.constant dense<0.000000e+00> : vector<6x1024xf32>
    %30 = tpu.matmul %3, %28, %cst_8 {dimension_numbers = #tpu.dot_dimension_numbers<[1], [0], [0], [1], [0, 0, 1, 1], [], []>} : vector<6x48xf32>, vector<48x1024xf32>, vector<6x1024xf32> -> vector<6x1024xf32>
    %cst_9 = arith.constant dense<0xFF800000> : vector<1024xf32>
    %31 = vector.multi_reduction <maximumf>, %30, %cst_9 [0] : vector<6x1024xf32> to vector<1024xf32>
    %32 = vector.shape_cast %31 : vector<1024xf32> to vector<1x1024xf32>
    %33 = vector.broadcast %32 : vector<1x1024xf32> to vector<6x1024xf32>
    %34 = arith.subf %30, %33 : vector<6x1024xf32>
    %35 = math.exp %34 : vector<6x1024xf32>
    %cst_10 = arith.constant dense<0.000000e+00> : vector<1024xf32>
    %36 = vector.multi_reduction <add>, %35, %cst_10 [0] : vector<6x1024xf32> to vector<1024xf32>
    %37 = vector.shape_cast %36 : vector<1024xf32> to vector<1x1024xf32>
    %38 = arith.mulf %35, %29 : vector<6x1024xf32>
    %cst_11 = arith.constant dense<0.000000e+00> : vector<1024xf32>
    %39 = vector.multi_reduction <add>, %38, %cst_11 [0] : vector<6x1024xf32> to vector<1024xf32>
    %40 = vector.shape_cast %39 : vector<1024xf32> to vector<1x1024xf32>
    %41 = tpu.reciprocal %37 {approx = true} : vector<1x1024xf32> -> vector<1x1024xf32>
    %42 = arith.mulf %40, %41 : vector<1x1024xf32>
    %c0_12 = arith.constant 0 : index
    %c0_13 = arith.constant 0 : index
    %43 = vector.load %arg5[%c0_12, %c0_13] : memref<1x1024xf32, #tpu.memory_space<vmem>>, vector<1x1024xf32>
    tpu.vector_store %arg5[%c0_12, %c0_13], %42 {strides = array<i32>} : memref<1x1024xf32, #tpu.memory_space<vmem>>, vector<1x1024xf32>,
    return
  }
  func.func @transform_0(%arg0: i32) -> (i32, i32) {
    %c0_i32 = arith.constant 0 : i32
    %c0_i32_0 = arith.constant 0 : i32
    return %c0_i32, %arg0 : i32, i32
  }
  func.func @transform_1(%arg0: i32) -> (i32, i32) {
    %c0_i32 = arith.constant 0 : i32
    %c0_i32_0 = arith.constant 0 : i32
    %c0_i32_1 = arith.constant 0 : i32
    return %c0_i32, %c0_i32_0 : i32, i32
  }
  func.func @transform_2(%arg0: i32) -> (i32, i32) {
    %c0_i32 = arith.constant 0 : i32
    %c0_i32_0 = arith.constant 0 : i32
    %c0_i32_1 = arith.constant 0 : i32
    return %c0_i32, %c0_i32_0 : i32, i32
  }
  func.func @transform_3(%arg0: i32) -> (i32, i32) {
    %c0_i32 = arith.constant 0 : i32
    %c0_i32_0 = arith.constant 0 : i32
    %c0_i32_1 = arith.constant 0 : i32
    return %c0_i32, %c0_i32_0 : i32, i32
  }
  func.func @transform_4(%arg0: i32) -> (i32, i32) {
    %c0_i32 = arith.constant 0 : i32
    %c0_i32_0 = arith.constant 0 : i32
    return %c0_i32, %arg0 : i32, i32
  }
}

</mosaic_0001>

<bundles_post_ra>
// kernel: tpu_custom_call.1
= control target key start
LH: loop header
LB: loop body
LE: loop exit
PB: predicated region body
PF: predicated region fallthrough
CT: control target
= control target key end

     0   :  { %9 = vsyncpa [#allocation3], 0  ;;  %s2709_s0 = inlined_call_operand.hbm [shape: f32[64,2048], index: 0, kind: input, shape index: {}]   ;;  %s2710_s1 = inlined_call_operand.hbm [shape: f32[54,96], index: 1, kind: input, shape index: {}]   ;;  %s2711_s2 = inlined_call_operand.vmem [shape: f32[48,1], index: 2, kind: input, shape index: {}]   ;;  %s2712_s3 = inlined_call_operand.vmem [shape: f32[6,48], index: 3, kind: input, shape index: {}]   ;;  %s2713_s4 = inlined_call_operand.hbm [shape: f32[1,2048], index: 4, kind: output, shape index: {}]  }
   0x1   :  { %11 = vsyncpa [#allocation3 + $0x1], 0 }
   0x2   :  { %12 = vsyncpa [#allocation6], 0 }
   0x3   :  { %13 = vsyncpa [#allocation4], 0 }
   0x4   :  { %15 = vsyncpa [#allocation4 + $0x1], 0  ;;  %s1951_s15 = smov 0   ;;  %s1953_s16 = smov 0  }
   0x5   :  { %s1955_s17 = smov 0   ;;  %s1957_s18 = smov 0  }
   0x6 LB: > { %s1972_s19 = sadd.s32 4294967295, %s1913_s18   ;;  %s1642_s20 = sadd.s32 4294967294, %s1913_s18   ;;  %s1913_s18 = sphi %s1957_s18, %s2735_s18   ;;  %s1909_s17 = sphi %s1955_s17, %s2734_s17   ;;  %s1905_s16 = sphi %s1953_s16, %s2733_s16   ;;  %s1901_s15 = sphi %s1951_s15, %s2732_s15  }
   0x7   : > { %s1976_s21 = sadd.s32 1, %s1913_s18   ;;  %s28_s22 = sadd.s32 1, %s1909_s17 }
   0x8   : > { %s25_s23 = ssub.s32 %s1913_s18, %s1976_s21  ;;  %p35_p0 = scmp.ne.s32.totalorder %s1909_s17, %s1905_s16 }
   0x9   : > { %p26_p1 = scmp.eq.s32.totalorder %s25_s23, 0  ;;  %p36_p2 = scmp.eq.s32.totalorder %s1913_s18, 0 }
   0xa   : > { %p41_p3 = scmp.ne.s32.totalorder %s1905_s16, %s1901_s15  ;;  %p2717_p4 = scmp.eq.s32.totalorder %s1972_s19, 0 }
   0xb   : > { %s1988_s24 = scalar_select %p26_p1, %s1909_s17, %s28_s22  }
   0xc   : > { %p1990_p5 = por %p36_p2, %p35_p0  ;;  %p1996_p6 = por %p2717_p4, %p41_p3 }
   0xd   : > { %p128_p7 = scmp.eq.s32.totalorder %s1972_s19, 1  ;;  %p134_p8 = scmp.eq.s32.totalorder %s1642_s20, 1 }
   0xe   : > { %s2719_s26 = scalar_select %p1996_p6, 1, 0 }
   0xf   : > { %p1643_p9 = scmp.ge.s32.totalorder %s1913_s18, 1  ;;  %p141_p10 = scmp.lt.s32.totalorder %s1913_s18, 3 }
  0x10   : > { %p2003_p11 = por %p128_p7, %p35_p0  ;;  %p2007_p12 = por %p134_p8, %p41_p3 }
  0x11   : > { %p2011_p13 = pnand %p1643_p9, %p141_p10  ;;  %s1915_s30 = smov [#allocation5]  }
  0x12   : > { %s2720_s27 = scalar_select %p2003_p11, 1, 0 }
  0x13   : > { %s2721_s28 = scalar_select %p2007_p12, 1, 0 }
  0x14   : > { %s2722_s29 = scalar_select %p2011_p13, 1, 0 }
  0x15   : > { %p1700_p1 = pneg %p2011_p13  ;;  %s153_s5 = sshll.u32 %s1915_s30, 4  ;;  %s154_s5 = int_to_ptr.vmem [resolvable:$true] %s153_s5 }
  0x16   : > { %p1713_p3 = scmp.lt.s32.totalorder %s1913_s18, 2  ;;  %s173_s7 = sand.u32 1, %s1909_s17  }
  0x17   : > { %p2019_p2 = pnand %p1700_p1, %p2717_p4  ;;  %s1802_s8 = scalar_lea.vmem %s154_s5, 896 }
  0x18   : > { %p1803_p8 = scmp.ne.s32.totalorder %s154_s5, %s1802_s8  ;;  %p1810_p12 = scmp.lt.s32.totalorder %s154_s5, %s154_s5 }
  0x19   : > { %p1793_p7 = pneg %p2019_p2  ;;  %p1811_p11 = scmp.lt.s32.totalorder %s1802_s8, %s1802_s8 }
  0x1b   : > { %p1805_p9 = pnand %p1803_p8, %p1793_p7  ;;  %p1812_p6 = por %p1811_p11, %p1810_p12 }
  0x1d   : > { %p1806_p10 = pneg %p1805_p9 }
  0x1f   : > { %p1813_p13 = pnand %p1812_p6, %p1806_p10 }
  0x21   : > { %1816 = shalt.err (!%p1813_p13)
}
  0x22   : > { %s1916_s9 = smov 128   ;;  %s1917_s10 = smov 8  }
  0x23   : > { %1703 = dma.hbm_to_vmem [thread:$0]  (!%p2019_p2), %s2710_s1, 896, %s154_s5, [#allocation6], %s1916_s9, %s1916_s9, %s1917_s10  }
  0x24   : > { %p2037_p1 = pnand %p1713_p3, %p1990_p5  ;;  %s1646_s14 = sshll.u32 %s173_s7, 9 }
  0x25   : > { %s1690_s20 = sshll.u32 %s1913_s18, 10  ;;  %s177_s6 = scalar_lea.vmem [#allocation2], %s1646_s14 }
  0x26   : > { %s2045_s30 = scalar_lea.hbm %s2709_s0, %s1690_s20  ;;  %s184_s8 = sshll.u32 %s177_s6, 4  ;;  %s2047_s8 = int_to_ptr.vmem [resolvable:$true] %s184_s8 }
  0x27   : > { %s2049_s25 = scalar_lea.sflag [#allocation3], %s173_s7  ;;  %s1817_s5 = scalar_lea.hbm %s2045_s30, 8192 }
  0x28   : > { %p1818_p5 = scmp.ne.s32.totalorder %s2045_s30, %s1817_s5  ;;  %p1819_p6 = pneg %p2037_p1 }
  0x29   : > { %s1822_s11 = scalar_lea.hbm %s2709_s0, 16384  ;;  %p1823_p13 = scmp.lt.s32.totalorder %s2045_s30, %s2709_s0 }
  0x2a   : > { %p1820_p11 = pnand %p1819_p6, %p1818_p5  ;;  %p1824_p2 = scmp.lt.s32.totalorder %s1822_s11, %s1817_s5 }
  0x2c   : > { %p1821_p12 = pneg %p1820_p11  ;;  %p1825_p3 = por %p1824_p2, %p1823_p13 }
  0x2e   : > { %p1826_p7 = pnand %p1825_p3, %p1821_p12 }
  0x30   : > { %1829 = shalt.err (!%p1826_p7)
}
  0x31   : > { %s1830_s7 = scalar_lea.vmem %s2047_s8, 8192  ;;  %s1918_s14 = smov [#allocation2]  }
  0x32   : > { %p1831_p8 = scmp.ne.s32.totalorder %s2047_s8, %s1830_s7  ;;  %s1835_s22 = sshll.u32 %s1918_s14, 4  ;;  %s1836_s22 = int_to_ptr.vmem [resolvable:$false] %s1835_s22 }
  0x33   : > { %s1837_s23 = scalar_lea.vmem %s1836_s22, 16384  ;;  %p1838_p5 = scmp.lt.s32.totalorder %s2047_s8, %s1836_s22 }
  0x34   : > { %p1833_p9 = pnand %p1831_p8, %p1819_p6  ;;  %p1839_p11 = scmp.lt.s32.totalorder %s1837_s23, %s1830_s7 }
  0x36   : > { %p1834_p10 = pneg %p1833_p9  ;;  %p1840_p0 = por %p1839_p11, %p1838_p5 }
  0x38   : > { %p1841_p4 = pnand %p1840_p0, %p1834_p10 }
  0x3a   : > { %1844 = shalt.err (!%p1841_p4)
}
  0x3b   : > { %s1919_s6 = smov 2048   ;;  %s1920_s5 = smov 1024  }
  0x3c   : > { %s1921_s9 = smov 64   ;;  %p2725_p6 = scmp.ne.s32.totalorder %s2722_s29, 0 }
  0x3d   : > { %1707 = dma.hbm_to_vmem [thread:$0]  (!%p2037_p1), %s2045_s30, 8192, %s2047_s8, %s2049_s25, %s1919_s6, %s1920_s5, %s1921_s9  }
  0x3e   : > { %196 = sbr.rel (%p2725_p6) target bundleno = 648 (0x288), region = 36  ;;  %s2073_s10 = sand.u32 (!%p2725_p6), 1, %s1905_s16  }
  0x3f   : > { %s1650_s11 = sshll.u32 (!%p2725_p6), %s2073_s10, 9  ;;  %s199_s12 = scalar_lea.sflag (!%p2725_p6), [#allocation3], %s2073_s10 }
  0x40   : > { %s2077_s20 = scalar_lea.vmem (!%p2725_p6), [#allocation2], %s1650_s11  ;;  %p2726_p4 = scmp.ne.s32.totalorder (!%p2725_p6), %s2719_s26, 0 }
  0x43   : > { %1888 = dma.done.wait (%p2726_p4), %s199_s12, 8192  }
  0x44   : > { %1890 = vsyncadd (%p2726_p4), %s199_s12, 4294959104  ;;  %p2727_p0 = scmp.eq.s32.totalorder %s1972_s19, 0 }
  0x46   : > { %1892 = dma.done.wait (%p2727_p0), [#allocation6], 896   ;;  %p2728_p1 = pmov %p2727_p0 }
  0x47   : > { %v1922_v0 = vmov 0.0   ;;  %v1923_v1 = vmov 0   ;;  %v2090_v2 = vld [vmem:[%s2077_s20 + $0x148] sm:$0xff]  ;;  %v2096_v4 = vld [vmem:[%s2077_s20 + $0x158] sm:$0xff]  ;;  %v2104_v7 = vld [vmem:[%s2077_s20 + $0x140] sm:$0xff]  ;;  %vm407_vm0 = vcmask 785408  }
  0x48   : > { %1894 = vsyncadd (%p2728_p1), [#allocation6], 4294966400  ;;  %493 = vmatprep.mubr.f32.mxu0 %v1922_v0  ;;  %600 = vmatprep.mubr.f32.mxu1 %v1922_v0  ;;  %v2093_v3 = vld [vmem:[%s2077_s20 + $0x1c8] sm:$0xff]  ;;  %v2101_v6 = vld [vmem:[%s2077_s20 + $0x1d8] sm:$0xff]  ;;  %vm983_vm1 = vcmask 392192   ;;  %vm1271_vm2 = vcmask 1045504  }
  0x49   : > { %1758 = vset.pattern.permute.xlu1 %v1923_v1  ;;  %1757 = vset.pattern.permute.xlu0 %v1923_v1  ;;  %v400_v5 = vmul.f32 %v2093_v3, %v2090_v2  ;;  %v2107_v8 = vld [vmem:[%s2077_s20 + $0x1c0] sm:$0xff]  ;;  %v402_v9 = vmul.f32 %v2101_v6, %v2096_v4  ;;  %v2114_v11 = vld [vmem:[%s2077_s20 + $0x150] sm:$0xff]  ;;  %v2120_v13 = vld [vmem:[%s2077_s20 + $0x108] sm:$0xff]  ;;  %s1652_s12 = sshll.u32 %s2073_s10, 3  ;;  %s1548_s25 = scalar_lea.sflag [#allocation4], %s2073_s10 }
  0x4a   : > { %v399_v10 = vmul.f32 %v2107_v8, %v2104_v7  ;;  %v2117_v12 = vld [vmem:[%s2077_s20 + $0x1d0] sm:$0xff]  ;;  %v2125_v15 = vld [vmem:[%s2077_s20 + $0x188] sm:$0xff]  ;;  %v2128_v16 = vld [vmem:[%s2077_s20 + $0x118] sm:$0xff]  ;;  %s230_s26 = scalar_lea.vmem [#allocation7], %s1652_s12  ;;  %p2729_p13 = scmp.ne.s32.totalorder %s2720_s27, 0 }
  0x4b   : > { %437 = vmatprep.subr.mxu0 %v400_v5  ;;  %v401_v14 = vmul.f32 %v2117_v12, %v2114_v11  ;;  %v2131_v17 = vld [vmem:[%s2077_s20 + $0x198] sm:$0xff]  ;;  %544 = vmatprep.subr.mxu1 %v402_v9  ;;  %v392_v18 = vmul.f32 %v2125_v15, %v2120_v13  ;;  %v2138_v20 = vld [vmem:[%s2077_s20 + $0x100] sm:$0xff]  ;;  %v2144_v22 = vld [vmem:[%s2077_s20 + $0x110] sm:$0xff]  ;;  %s1562_s29 = sshll.u32 %s230_s26, 4  ;;  %s1925_s14 = smov [#allocation7]   ;;  %s1563_s29 = int_to_ptr.vmem [resolvable:$true] %s1562_s29 }
  0x4c   : > { %438 = vmatpush1.msra.mxu0 %v399_v10  ;;  %v394_v19 = vmul.f32 %v2131_v17, %v2128_v16  ;;  %v2141_v21 = vld [vmem:[%s2077_s20 + $0x180] sm:$0xff]  ;;  %v283_v24 = vld [vmem:[%s2077_s20 + $0x190] sm:$0xff]  ;;  %v2150_v25 = vld [vmem:[%s2077_s20 + $0xc8] sm:$0xff]  ;;  %s1845_s7 = scalar_lea.vmem %s1563_s29, 128  ;;  %s1849_s22 = sshll.u32 %s1925_s14, 4  ;;  %s1850_s22 = int_to_ptr.vmem [resolvable:$false] %s1849_s22 }
  0x4d   : > { %545 = vmatpush1.msra.mxu1 %v401_v14  ;;  %v391_v23 = vmul.f32 %v2141_v21, %v2138_v20  ;;  %v2153_v26 = vld [vmem:[%s2077_s20 + $0xd8] sm:$0xff]  ;;  %439 = vmatprep.subr.mxu0 %v392_v18  ;;  %v393_v27 = vmul.f32 %v283_v24, %v2144_v22  ;;  %v384_v28 = vmul.f32 %v2093_v3, %v2150_v25  ;;  %v2161_v30 = vld [vmem:[%s2077_s20 + $0xc0] sm:$0xff]  ;;  %v2164_v31 = vld [vmem:[%s2077_s20 + $0xd0] sm:$0xff]  ;;  %p1846_p12 = scmp.ne.s32.totalorder %s1563_s29, %s1845_s7  ;;  %p1852_p7 = scmp.lt.s32.totalorder %s1563_s29, %s1850_s22 }
  0x4e   : > { %546 = vmatprep.subr.mxu1 %v394_v19  ;;  %v386_v29 = vmul.f32 %v2101_v6, %v2153_v26  ;;  %v2167_v32 = vld [vmem:[%s2077_s20 + $0x88] sm:$0xff]  ;;  %v383_v33 = vmul.f32 %v2107_v8, %v2161_v30  ;;  %v385_v34 = vmul.f32 %v2117_v12, %v2164_v31  ;;  %v2176_v36 = vld [vmem:[%s2077_s20 + $0x98] sm:$0xff]  ;;  %v2179_v37 = vld [vmem:[%s2077_s20 + $0x80] sm:$0xff]  ;;  %v368_v39 = vmul.f32 %v2090_v2, %v2150_v25 }
  0x4f   : > { %440 = vmatpush1.msra.mxu0 %v391_v23  ;;  %v376_v35 = vmul.f32 %v2125_v15, %v2167_v32  ;;  %v2182_v38 = vld [vmem:[%s2077_s20 + $0x90] sm:$0xff]  ;;  %547 = vmatpush1.msra.mxu1 %v393_v27  ;;  %v378_v40 = vmul.f32 %v2131_v17, %v2176_v36  ;;  %v375_v41 = vmul.f32 %v2141_v21, %v2179_v37  ;;  %v242_v45 = vld [vmem:[%s2077_s20 + $0x48] sm:$0xff]  ;;  %v244_v48 = vld [vmem:[%s2077_s20 + $0x58] sm:$0xff]  ;;  %p1847_p2 = pnand %p1846_p12, %p2729_p13 }
  0x50   : > { %441 = vmatprep.subr.mxu0 %v384_v28  ;;  %v377_v42 = vmul.f32 %v283_v24, %v2182_v38  ;;  %548 = vmatprep.subr.mxu1 %v386_v29  ;;  %v370_v43 = vmul.f32 %v2096_v4, %v2153_v26  ;;  %v367_v44 = vmul.f32 %v2104_v7, %v2161_v30  ;;  %v241_v49 = vld [vmem:[%s2077_s20 + $0x40] sm:$0xff]  ;;  %v243_v52 = vld [vmem:[%s2077_s20 + $0x50] sm:$0xff]  ;;  %v234_v53 = vld [vmem:[%s2077_s20 + $0x8] sm:$0xff] }
  0x51   : > { %442 = vmatpush1.msra.mxu0 %v383_v33  ;;  %549 = vmatpush1.msra.mxu1 %v385_v34  ;;  %v369_v46 = vmul.f32 %v2114_v11, %v2164_v31  ;;  %v360_v47 = vmul.f32 %v2120_v13, %v2167_v32  ;;  %v362_v50 = vmul.f32 %v2128_v16, %v2176_v36  ;;  %v236_v56 = vld [vmem:[%s2077_s20 + $0x18] sm:$0xff]  ;;  %v233_v57 = vld [vmem:[%s2077_s20] sm:$0xff]  ;;  %v235_v60 = vld [vmem:[%s2077_s20 + $0x10] sm:$0xff]  ;;  %p1848_p3 = pneg %p1847_p2 }
  0x52   : > { %443 = vmatprep.subr.mxu0 %v376_v35  ;;  %550 = vmatprep.subr.mxu1 %v378_v40  ;;  %v359_v51 = vmul.f32 %v2138_v20, %v2179_v37  ;;  %v361_v54 = vmul.f32 %v2144_v22, %v2182_v38  ;;  %v352_v55 = vmul.f32 %v2093_v3, %v242_v45  ;;  %v2240_v18 = vld [vmem:[%s2077_s20 + $0x178] sm:$0xff]  ;;  %v2251_v23 = vld [vmem:[%s2077_s20 + $0x1e0] sm:$0xff]  ;;  %v2265_v29 = vld [vmem:[%s2077_s20 + $0x128] sm:$0xff] }
  0x53   : > { %444 = vmatpush1.msra.mxu0 %v375_v41  ;;  %551 = vmatpush1.msra.mxu1 %v377_v42  ;;  %v354_v58 = vmul.f32 %v2101_v6, %v244_v48  ;;  %v351_v59 = vmul.f32 %v2107_v8, %v241_v49  ;;  %v353_v61 = vmul.f32 %v2117_v12, %v243_v52  ;;  %v2260_v27 = vld [vmem:[#allocation5] sm:$0xff]  ;;  %v2275_v33 = vld [vmem:[%s2077_s20 + $0x138] sm:$0xff]  ;;  %v2296_v40 = vld [vmem:[%s2077_s20 + $0x1b0] sm:$0xff] }
  0x54   : > { %445 = vmatprep.subr.mxu0 %v368_v39  ;;  %552 = vmatprep.subr.mxu1 %v370_v43  ;;  %v344_v62 = vmul.f32 %v2125_v15, %v234_v53  ;;  %v346_v63 = vmul.f32 %v2131_v17, %v236_v56  ;;  %v343_v1 = vmul.f32 %v2141_v21, %v233_v57  ;;  %v2237_v17 = vld [vmem:[%s2077_s20 + $0x1e8] sm:$0xff]  ;;  %v2245_v21 = vld [vmem:[%s2077_s20 + $0x1f8] sm:$0xff]  ;;  %v2293_v39 = vld [vmem:[%s2077_s20 + $0x130] sm:$0xff] }
  0x55   : > { %446 = vmatpush1.msra.mxu0 %v367_v44  ;;  %553 = vmatpush1.msra.mxu1 %v369_v46  ;;  %v345_v3 = vmul.f32 %v283_v24, %v235_v60  ;;  %v336_v5 = vmul.f32 %v2090_v2, %v242_v45  ;;  %v338_v6 = vmul.f32 %v2096_v4, %v244_v48  ;;  %v2278_v34 = vld [vmem:[%s2077_s20 + $0x1b8] sm:$0xff]  ;;  %v2299_v41 = vld [vmem:[%s2077_s20 + $0xe8] sm:$0xff]  ;;  %v2309_v44 = vld [vmem:[%s2077_s20 + $0xe0] sm:$0xff] }
  0x56   : > { %447 = vmatprep.subr.mxu0 %v360_v47  ;;  %554 = vmatprep.subr.mxu1 %v362_v50  ;;  %v335_v8 = vmul.f32 %v2104_v7, %v241_v49  ;;  %v337_v9 = vmul.f32 %v2114_v11, %v243_v52  ;;  %v328_v10 = vmul.f32 %v2120_v13, %v234_v53  ;;  %v2306_v43 = vld [vmem:[%s2077_s20 + $0xf8] sm:$0xff]  ;;  %v2316_v47 = vld [vmem:[%s2077_s20 + $0xf0] sm:$0xff]  ;;  %v2324_v50 = vld [vmem:[%s2077_s20 + $0xa8] sm:$0xff] }
  0x57   : > { %448 = vmatpush1.msra.mxu0 %v359_v51  ;;  %555 = vmatpush1.msra.mxu1 %v361_v54  ;;  %v330_v12 = vmul.f32 %v2128_v16, %v236_v56  ;;  %v327_v2 = vmul.f32 %v2138_v20, %v233_v57  ;;  %v329_v4 = vmul.f32 %v2144_v22, %v235_v60  ;;  %v2234_v16 = vld [vmem:[%s2077_s20 + $0x168] sm:$0xff]  ;;  %v2248_v22 = vld [vmem:[%s2077_s20 + $0x160] sm:$0xff] }
  0x58   : > { %449 = vmatprep.subr.mxu0 %v352_v55  ;;  %556 = vmatprep.subr.mxu1 %v354_v58  ;;  %v320_v7 = vmul.f32 %v2150_v25, %v242_v45  ;;  %v322_v11 = vmul.f32 %v2153_v26, %v244_v48  ;;  %v319_v13 = vmul.f32 %v2161_v30, %v241_v49  ;;  %v2255_v25 = vld [vmem:[%s2077_s20 + $0x170] sm:$0xff]  ;;  %v2268_v30 = vld [vmem:[%s2077_s20 + $0x1a8] sm:$0xff]  ;;  %v2339_v55 = vld [vmem:[%s2077_s20 + $0xa0] sm:$0xff] }
  0x59   : > { %450 = vmatpush1.msra.mxu0 %v351_v59  ;;  %557 = vmatpush1.msra.mxu1 %v353_v61  ;;  %v321_v14 = vmul.f32 %v2164_v31, %v243_v52  ;;  %v312_v15 = vmul.f32 %v2167_v32, %v234_v53  ;;  %v314_v19 = vmul.f32 %v2176_v36, %v236_v56  ;;  %v2258_v26 = vld [vmem:[%s2077_s20 + $0x1f0] sm:$0xff]  ;;  %v2283_v36 = vld [vmem:[%s2077_s20 + $0x120] sm:$0xff]  ;;  %v2311_v45 = vld [vmem:[#allocation5 + $0x8] sm:$0xff] }
  0x5a   : > { %451 = vmatprep.subr.mxu0 %v344_v62  ;;  %558 = vmatprep.subr.mxu1 %v346_v63  ;;  %v311_v20 = vmul.f32 %v2179_v37, %v233_v57  ;;  %v313_v24 = vmul.f32 %v2182_v38, %v235_v60  ;;  %v404_v28 = vmul.f32 %v2237_v17, %v2234_v16  ;;  %v2286_v37 = vld [vmem:[%s2077_s20 + $0x1a0] sm:$0xff]  ;;  %v2332_v53 = vld [vmem:[%s2077_s20 + $0xb8] sm:$0xff]  ;;  %v2346_v57 = vld [vmem:[%s2077_s20 + $0xb0] sm:$0xff] }
  0x5b   : > { %452 = vmatpush1.msra.mxu0 %v343_v1  ;;  %559 = vmatpush1.msra.mxu1 %v345_v3  ;;  %v406_v31 = vmul.f32 %v2245_v21, %v2240_v18  ;;  %v403_v32 = vmul.f32 %v2251_v23, %v2248_v22  ;;  %v405_v35 = vmul.f32 %v2258_v26, %v2255_v25  ;;  %v2350_v59 = vld [vmem:[#allocation5 + $0x10] sm:$0xff] }
  0x5c   : > { %453 = vmatprep.subr.mxu0 %v336_v5  ;;  %560 = vmatprep.subr.mxu1 %v338_v6  ;;  %v396_v38 = vmul.f32 %v2268_v30, %v2265_v29  ;;  %v398_v42 = vmul.f32 %v2278_v34, %v2275_v33  ;;  %v395_v46 = vmul.f32 %v2286_v37, %v2283_v36  ;;  %v2371_v5 = vld [vmem:[%s2077_s20 + $0x68] sm:$0xff]  ;;  %v2373_v6 = vld [vmem:[#allocation5 + $0x18] sm:$0xff] }
  0x5d   : > { %454 = vmatpush1.msra.mxu0 %v335_v8  ;;  %561 = vmatpush1.msra.mxu1 %v337_v9  ;;  %v397_v48 = vmul.f32 %v2296_v40, %v2293_v39  ;;  %v388_v49 = vmul.f32 %v2237_v17, %v2299_v41  ;;  %v390_v51 = vmul.f32 %v2245_v21, %v2306_v43  ;;  %v2378_v9 = vld [vmem:[%s2077_s20 + $0x78] sm:$0xff] }
  0x5e   : > { %455 = vmatprep.subr.mxu0 %v328_v10  ;;  %562 = vmatprep.subr.mxu1 %v330_v12  ;;  %v387_v52 = vmul.f32 %v2251_v23, %v2309_v44  ;;  %v389_v54 = vmul.f32 %v2258_v26, %v2316_v47  ;;  %v380_v56 = vmul.f32 %v2268_v30, %v2324_v50 }
  0x5f   : > { %456 = vmatpush1.msra.mxu0 %v327_v2  ;;  %563 = vmatpush1.msra.mxu1 %v329_v4  ;;  %v382_v58 = vmul.f32 %v2278_v34, %v2332_v53  ;;  %v379_v60 = vmul.f32 %v2286_v37, %v2339_v55  ;;  %v381_v61 = vmul.f32 %v2296_v40, %v2346_v57  ;;  %v245_v2 = vld [vmem:[%s2077_s20 + $0x60] sm:$0xff] }
  0x60   : > { %457 = vmatprep.subr.mxu0 %v320_v7  ;;  %564 = vmatprep.subr.mxu1 %v322_v11  ;;  %v372_v62 = vmul.f32 %v2234_v16, %v2299_v41  ;;  %v374_v63 = vmul.f32 %v2240_v18, %v2306_v43  ;;  %v371_v1 = vmul.f32 %v2248_v22, %v2309_v44  ;;  %v247_v11 = vld [vmem:[%s2077_s20 + $0x70] sm:$0xff] }
  0x61   : > { %458 = vmatpush1.msra.mxu0 %v319_v13  ;;  %565 = vmatpush1.msra.mxu1 %v321_v14  ;;  %v373_v3 = vmul.f32 %v2255_v25, %v2316_v47  ;;  %v364_v8 = vmul.f32 %v2265_v29, %v2324_v50  ;;  %v366_v10 = vmul.f32 %v2275_v33, %v2332_v53  ;;  %v238_v14 = vld [vmem:[%s2077_s20 + $0x28] sm:$0xff] }
  0x62   : > { %459 = vmatprep.subr.mxu0 %v312_v15  ;;  %566 = vmatprep.subr.mxu1 %v314_v19  ;;  %v363_v12 = vmul.f32 %v2283_v36, %v2339_v55  ;;  %v365_v4 = vmul.f32 %v2293_v39, %v2346_v57  ;;  %v356_v7 = vmul.f32 %v2237_v17, %v2371_v5  ;;  %v240_v19 = vld [vmem:[%s2077_s20 + $0x38] sm:$0xff] }
  0x63   : > { %460 = vmatpush1.msra.mxu0 %v311_v20  ;;  %567 = vmatpush1.msra.mxu1 %v313_v24  ;;  %v358_v13 = vmul.f32 %v2245_v21, %v2378_v9  ;;  %v355_v15 = vmul.f32 %v2251_v23, %v245_v2  ;;  %v237_v20 = vld [vmem:[%s2077_s20 + $0x20] sm:$0xff]  ;;  %v357_v17 = vmul.f32 %v2258_v26, %v247_v11  ;;  %v239_v24 = vld [vmem:[%s2077_s20 + $0x30] sm:$0xff]  ;;  %s1691_s20 = sshll.u32 %s1972_s19, 7  ;;  %s1851_s19 = scalar_lea.vmem %s1850_s22, 256 }
  0x64   : > { %1653 = vmatmul.mubr.msk.f32.vlgmr.msra.gmra.mxu0 %vm407_vm0, %v2260_v27  ;;  %1660 = vmatmul.mubr.msk.f32.vlgmr.msra.gmra.mxu1 %vm407_vm0, %v2260_v27  ;;  %v348_v21 = vmul.f32 %v2268_v30, %v238_v14  ;;  %v347_v23 = vmul.f32 %v2286_v37, %v237_v20  ;;  %v340_v26 = vmul.f32 %v2234_v16, %v2371_v5  ;;  %s1560_s8 = scalar_lea.hbm %s2713_s4, %s1691_s20  ;;  %p1853_p8 = scmp.lt.s32.totalorder %s1851_s19, %s1845_s7 }
  0x65   : > { %651 = vmatprep.subr.mxu0 %v404_v28  ;;  %758 = vmatprep.subr.mxu1 %v406_v31  ;;  %v2404_v28 = vld [vmem:[#allocation5 + $0x20] sm:$0xff]  ;;  %v350_v31 = vmul.f32 %v2278_v34, %v240_v19  ;;  %v342_v30 = vmul.f32 %v2240_v18, %v2378_v9  ;;  %v2420_v34 = vld [vmem:[#allocation5 + $0x28] sm:$0xff]  ;;  %v341_v37 = vmul.f32 %v2255_v25, %v247_v11  ;;  %v2434_v25 = vld [vmem:[#allocation5 + $0x30] sm:$0x3f] }
  0x66   : > { %652 = vmatpush1.msra.mxu0 %v403_v32  ;;  %759 = vmatpush1.msra.mxu1 %v405_v35  ;;  %v349_v32 = vmul.f32 %v2296_v40, %v239_v24  ;;  %v339_v35 = vmul.f32 %v2248_v22, %v245_v2  ;;  %v332_v16 = vmul.f32 %v2265_v29, %v238_v14  ;;  %p1854_p9 = por %p1853_p8, %p1852_p7 }
  0x67   : > { %499 = vmatprep.mubr.f32.mxu0 %v1922_v0  ;;  %606 = vmatprep.mubr.f32.mxu1 %v1922_v0  ;;  %v331_v18 = vmul.f32 %v2283_v36, %v237_v20  ;;  %v333_v22 = vmul.f32 %v2293_v39, %v239_v24  ;;  %v324_v29 = vmul.f32 %v2299_v41, %v2371_v5 }
  0x68   : > { %653 = vmatprep.subr.mxu0 %v396_v38  ;;  %760 = vmatprep.subr.mxu1 %v398_v42  ;;  %v334_v38 = vmul.f32 %v2275_v33, %v240_v19  ;;  %v326_v33 = vmul.f32 %v2306_v43, %v2378_v9  ;;  %v323_v36 = vmul.f32 %v2309_v44, %v245_v2  ;;  %v307_v44 = vld [vmem:[%s2711_s2 + $0x18] sm:$0xff]  ;;  %p1855_p10 = pnand %p1854_p9, %p1848_p3 }
  0x69   : > { %1654 = vmatmul.mubr.msk.f32.gmra.mxu0 %vm407_vm0, %v2311_v45  ;;  %1661 = vmatmul.mubr.msk.f32.gmra.mxu1 %vm407_vm0, %v2311_v45  ;;  %v325_v39 = vmul.f32 %v2316_v47, %v247_v11  ;;  %v316_v40 = vmul.f32 %v2324_v50, %v238_v14  ;;  %v318_v41 = vmul.f32 %v2332_v53, %v240_v19  ;;  %v306_v47 = vld [vmem:[%s2711_s2 + $0x10] sm:$0xff] }
  0x6a   : > { %654 = vmatpush1.msra.mxu0 %v395_v46  ;;  %761 = vmatpush1.msra.mxu1 %v397_v48  ;;  %v315_v42 = vmul.f32 %v2339_v55, %v237_v20  ;;  %v317_v43 = vmul.f32 %v2346_v57, %v239_v24  ;;  %v309_v46 = vld [vmem:[%s2711_s2 + $0x28] sm:$0xff]  ;;  %v308_v48 = vld [vmem:[%s2711_s2 + $0x20] sm:$0xff] }
  0x6b   : > { %655 = vmatprep.subr.mxu0 %v388_v49  ;;  %762 = vmatprep.subr.mxu1 %v390_v51  ;;  %v305_v49 = vld [vmem:[%s2711_s2 + $0x8] sm:$0xff] }
  0x6c   : > { %656 = vmatpush1.msra.mxu0 %v387_v52  ;;  %763 = vmatpush1.msra.mxu1 %v389_v54 }
  0x6d   : > { %505 = vmatprep.mubr.f32.mxu0 %v1922_v0  ;;  %612 = vmatprep.mubr.f32.mxu1 %v1922_v0 }
  0x6e   : > { %657 = vmatprep.subr.mxu0 %v380_v56  ;;  %764 = vmatprep.subr.mxu1 %v382_v58 }
  0x6f   : > { %1655 = vmatmul.mubr.msk.f32.gmra.mxu0 %vm407_vm0, %v2350_v59  ;;  %1662 = vmatmul.mubr.msk.f32.gmra.mxu1 %vm407_vm0, %v2350_v59 }
  0x70   : > { %658 = vmatpush1.msra.mxu0 %v379_v60  ;;  %765 = vmatpush1.msra.mxu1 %v381_v61 }
  0x71   : > { %659 = vmatprep.subr.mxu0 %v372_v62  ;;  %766 = vmatprep.subr.mxu1 %v374_v63 }
  0x72   : > { %511 = vmatprep.mubr.f32.mxu0 %v1922_v0  ;;  %618 = vmatprep.mubr.f32.mxu1 %v1922_v0 }
  0x73   : > { %660 = vmatpush1.msra.mxu0 %v371_v1  ;;  %767 = vmatpush1.msra.mxu1 %v373_v3 }
  0x74   : > { %1656 = vmatmul.mubr.msk.f32.gmra.mxu0 %vm407_vm0, %v2373_v6  ;;  %1663 = vmatmul.mubr.msk.f32.gmra.mxu1 %vm407_vm0, %v2373_v6 }
  0x75   : > { %661 = vmatprep.subr.mxu0 %v364_v8  ;;  %768 = vmatprep.subr.mxu1 %v366_v10 }
  0x76   : > { %662 = vmatpush1.msra.mxu0 %v363_v12  ;;  %769 = vmatpush1.msra.mxu1 %v365_v4 }
  0x77   : > { %663 = vmatprep.subr.mxu0 %v356_v7  ;;  %770 = vmatprep.subr.mxu1 %v358_v13 }
  0x78   : > { %517 = vmatprep.mubr.f32.mxu0 %v1922_v0  ;;  %624 = vmatprep.mubr.f32.mxu1 %v1922_v0 }
  0x79   : > { %664 = vmatpush1.msra.mxu0 %v355_v15  ;;  %771 = vmatpush1.msra.mxu1 %v357_v17 }
  0x7a   : > { %1657 = vmatmul.mubr.msk.f32.gmra.mxu0 %vm407_vm0, %v2404_v28  ;;  %1664 = vmatmul.mubr.msk.f32.gmra.mxu1 %vm407_vm0, %v2404_v28 }
  0x7b   : > { %665 = vmatprep.subr.mxu0 %v348_v21  ;;  %772 = vmatprep.subr.mxu1 %v350_v31 }
  0x7c   : > { %666 = vmatpush1.msra.mxu0 %v347_v23  ;;  %773 = vmatpush1.msra.mxu1 %v349_v32 }
  0x7d   : > { %523 = vmatprep.mubr.f32.mxu0 %v1922_v0  ;;  %630 = vmatprep.mubr.f32.mxu1 %v1922_v0 }
  0x7e   : > { %667 = vmatprep.subr.mxu0 %v340_v26  ;;  %774 = vmatprep.subr.mxu1 %v342_v30 }
  0x7f   : > { %1658 = vmatmul.mubr.msk.f32.gmra.mxu0 %vm407_vm0, %v2420_v34  ;;  %1665 = vmatmul.mubr.msk.f32.gmra.mxu1 %vm407_vm0, %v2420_v34 }
  0x80   : > { %668 = vmatpush1.msra.mxu0 %v339_v35  ;;  %775 = vmatpush1.msra.mxu1 %v341_v37 }
  0x81   : > { %669 = vmatprep.subr.mxu0 %v332_v16  ;;  %776 = vmatprep.subr.mxu1 %v334_v38 }
  0x82   : > { %670 = vmatpush1.msra.mxu0 %v331_v18  ;;  %777 = vmatpush1.msra.mxu1 %v333_v22 }
  0x83   : > { %529 = vmatprep.mubr.f32.mxu0 %v1922_v0  ;;  %636 = vmatprep.mubr.f32.mxu1 %v1922_v0 }
  0x84   : > { %1659 = vmatmul.mubr.msk.f32.gmra.mxu0 %vm407_vm0, %v2434_v25  ;;  %1666 = vmatmul.mubr.msk.f32.gmra.mxu1 %vm407_vm0, %v2434_v25 }
  0x85   : > { %671 = vmatprep.subr.mxu0 %v324_v29  ;;  %778 = vmatprep.subr.mxu1 %v326_v33 }
  0x86   : > { %672 = vmatpush1.msra.mxu0 %v323_v36  ;;  %779 = vmatpush1.msra.mxu1 %v325_v39 }
  0x87   : > { %673 = vmatprep.subr.mxu0 %v316_v40  ;;  %780 = vmatprep.subr.mxu1 %v318_v41 }
  0x88   : > { %674 = vmatpush1.msra.mxu0 %v315_v42  ;;  %707 = vmatprep.mubr.f32.mxu0 %v1922_v0 }
  0x89   : > { %781 = vmatpush1.msra.mxu1 %v317_v43  ;;  %814 = vmatprep.mubr.f32.mxu1 %v1922_v0 }
  0x8a   : > { %1667 = vmatmul.mubr.msk.f32.vlgmr.msra.gmra.mxu0 %vm407_vm0, %v2260_v27  ;;  %1674 = vmatmul.mubr.msk.f32.vlgmr.msra.gmra.mxu1 %vm407_vm0, %v2260_v27  ;;  %v304_v27 = vld [vmem:[%s2711_s2] sm:$0xff] }
  0x8b   : > { %713 = vmatprep.mubr.f32.mxu0 %v1922_v0  ;;  %820 = vmatprep.mubr.f32.mxu1 %v1922_v0 }
  0x8c   : > { %874 = vperm.xlu1 %1758, %v307_v44   ;;  %884 = vperm.xlu0 %1757, %v309_v46  }
  0x8e   : > { %1668 = vmatmul.mubr.msk.f32.gmra.mxu0 %vm407_vm0, %v2311_v45  ;;  %1675 = vmatmul.mubr.msk.f32.gmra.mxu1 %vm407_vm0, %v2311_v45 }
  0x8f   : > { %719 = vmatprep.mubr.f32.mxu0 %v1922_v0  ;;  %826 = vmatprep.mubr.f32.mxu1 %v1922_v0 }
  0x90   : > { %869 = vperm.xlu1 %1758, %v306_v47   ;;  %879 = vperm.xlu0 %1757, %v308_v48  }
  0x92   : > { %1669 = vmatmul.mubr.msk.f32.gmra.mxu0 %vm407_vm0, %v2350_v59  ;;  %1676 = vmatmul.mubr.msk.f32.gmra.mxu1 %vm407_vm0, %v2350_v59 }
  0x93   : > { %725 = vmatprep.mubr.f32.mxu0 %v1922_v0  ;;  %832 = vmatprep.mubr.f32.mxu1 %v1922_v0 }
  0x94   : > { %859 = vperm.xlu1 %1758, %v304_v27   ;;  %864 = vperm.xlu0 %1757, %v305_v49  }
  0x96   : > { %1670 = vmatmul.mubr.msk.f32.gmra.mxu0 %vm407_vm0, %v2373_v6  ;;  %1677 = vmatmul.mubr.msk.f32.gmra.mxu1 %vm407_vm0, %v2373_v6 }
  0x97   : > { %731 = vmatprep.mubr.f32.mxu0 %v1922_v0  ;;  %838 = vmatprep.mubr.f32.mxu1 %v1922_v0 }
  0x9a   : > { %1671 = vmatmul.mubr.msk.f32.gmra.mxu0 %vm407_vm0, %v2404_v28  ;;  %1678 = vmatmul.mubr.msk.f32.gmra.mxu1 %vm407_vm0, %v2404_v28 }
  0x9b   : > { %737 = vmatprep.mubr.f32.mxu0 %v1922_v0  ;;  %844 = vmatprep.mubr.f32.mxu1 %v1922_v0 }
  0x9e   : > { %1672 = vmatmul.mubr.msk.f32.gmra.mxu0 %vm407_vm0, %v2420_v34  ;;  %1679 = vmatmul.mubr.msk.f32.gmra.mxu1 %vm407_vm0, %v2420_v34 }
  0x9f   : > { %743 = vmatprep.mubr.f32.mxu0 %v1922_v0  ;;  %850 = vmatprep.mubr.f32.mxu1 %v1922_v0 }
  0xa2   : > { %1673 = vmatmul.mubr.msk.f32.gmra.mxu0 %vm407_vm0, %v2434_v25  ;;  %1680 = vmatmul.mubr.msk.f32.gmra.mxu1 %vm407_vm0, %v2434_v25 }
  0xa3   : > { %1051 = vmatprep.mubr.f32.mxu0 %v1922_v0  ;;  %1122 = vmatprep.mubr.f32.mxu1 %v1922_v0 }
 0x107   : > { %v2526_v3 = vpop.permute.xlu0 %884  ;;  %v2528_v8 = vpop.permute.xlu1 %874 }
 0x10b   : > { %v2530_v2 = vpop.permute.xlu0 %879  ;;  %v2533_v13 = vpop.permute.xlu1 %869 }
 0x10f   : > { %v2549_v16 = vpop.permute.xlu0 %864  ;;  %v2559_v42 = vpop.permute.xlu1 %859 }
 0x124   : > { %v2514_v45 = vpop.f32.mrf.mxu0  ;;  %v2516_v50 = vpop.f32.mrf.mxu1 }
 0x126   : > { %v2518_v51 = vpop.f32.mrf.mxu0  ;;  %v2520_v52 = vpop.f32.mrf.mxu1 }
 0x129   : > { %v2522_v53 = vpop.f32.mrf.mxu0  ;;  %v2524_v54 = vpop.f32.mrf.mxu1 }
 0x12b   : > { %v503_v55 = vpop.f32.mrf.mxu0  ;;  %v610_v56 = vpop.f32.mrf.mxu1 }
 0x12c   : > { %v896_v43 = vadd.f32 %v2549_v16, %v503_v55  ;;  %v898_v48 = vadd.f32 %v2549_v16, %v610_v56  ;;  %v890_v56 = vadd.f32 %v2559_v42, %v2520_v52 }
 0x12f   : > { %v507_v57 = vpop.f32.mrf.mxu0  ;;  %v614_v58 = vpop.f32.mrf.mxu1 }
 0x130   : > { %v903_v33 = vadd.f32 %v2533_v13, %v507_v57  ;;  %v905_v44 = vadd.f32 %v2533_v13, %v614_v58  ;;  %v895_v57 = vadd.f32 %v2549_v16, %v2522_v53  ;;  %v897_v58 = vadd.f32 %v2549_v16, %v2524_v54 }
 0x131   : > { %v509_v59 = vpop.f32.mrf.mxu0  ;;  %v616_v60 = vpop.f32.mrf.mxu1  ;;  %v944_v53 = vmax.f32 %v896_v43, 0.0  ;;  %v889_v54 = vadd.f32 %v2559_v42, %v2516_v50  ;;  %v2591_v50 = vld [vmem:[%s2712_s3] sm:$0x3f] }
 0x132   : > { %v904_v38 = vadd.f32 %v2533_v13, %v509_v59  ;;  %v906_v36 = vadd.f32 %v2533_v13, %v616_v60  ;;  %v888_v59 = vadd.f32 %v2559_v42, %v2518_v51  ;;  %v887_v51 = vadd.f32 %v2559_v42, %v2514_v45 }
 0x133   : > { %v945_v45 = vmax.f32 %v897_v58, 0.0 }
 0x134   : > { %v513_v61 = vpop.f32.mrf.mxu0  ;;  %v620_v62 = vpop.f32.mrf.mxu1  ;;  %v952_v60 = vmax.f32 %v904_v38, 0.0 }
 0x135   : > { %v911_v26 = vadd.f32 %v2528_v8, %v513_v61  ;;  %v913_v18 = vadd.f32 %v2528_v8, %v620_v62  ;;  %v951_v62 = vmax.f32 %v903_v33, 0.0 }
 0x136   : > { %v515_v63 = vpop.f32.mrf.mxu0  ;;  %v622_v1 = vpop.f32.mrf.mxu1 }
 0x137   : > { %v912_v21 = vadd.f32 %v2528_v8, %v515_v63  ;;  %v914_v30 = vadd.f32 %v2528_v8, %v622_v1  ;;  %v959_v27 = vmax.f32 %v911_v26, 0.0  ;;  %v961_v55 = vmax.f32 %v913_v18, 0.0 }
 0x138   : > { %v954_v63 = vmax.f32 %v906_v36, 0.0 }
 0x139   : > { %v960_v46 = vmax.f32 %v912_v21, 0.0  ;;  %v962_v49 = vmax.f32 %v914_v30, 0.0 }
 0x13a   : > { %v519_v5 = vpop.f32.mrf.mxu0  ;;  %v626_v6 = vpop.f32.mrf.mxu1 }
 0x13b   : > { %v919_v17 = vadd.f32 %v2530_v2, %v519_v5  ;;  %v921_v31 = vadd.f32 %v2530_v2, %v626_v6  ;;  %v953_v5 = vmax.f32 %v905_v44, 0.0 }
 0x13c   : > { %v521_v9 = vpop.f32.mrf.mxu0  ;;  %v628_v10 = vpop.f32.mrf.mxu1 }
 0x13d   : > { %v920_v14 = vadd.f32 %v2530_v2, %v521_v9  ;;  %v922_v24 = vadd.f32 %v2530_v2, %v628_v10  ;;  %v967_v39 = vmax.f32 %v919_v17, 0.0  ;;  %v969_v47 = vmax.f32 %v921_v31, 0.0 }
 0x13e   : > { %v946_v9 = vmax.f32 %v898_v48, 0.0  ;;  %v943_v10 = vmax.f32 %v895_v57, 0.0 }
 0x13f   : > { %v525_v12 = vpop.f32.mrf.mxu0  ;;  %v632_v4 = vpop.f32.mrf.mxu1  ;;  %v968_v22 = vmax.f32 %v920_v14, 0.0  ;;  %v970_v40 = vmax.f32 %v922_v24, 0.0  ;;  %v935_v14 = vmax.f32 %v887_v51, 0.0 }
 0x140   : > { %v927_v7 = vadd.f32 %v2526_v3, %v525_v12  ;;  %v929_v15 = vadd.f32 %v2526_v3, %v632_v4  ;;  %v936_v12 = vmax.f32 %v888_v59, 0.0 }
 0x141   : > { %v527_v11 = vpop.f32.mrf.mxu0  ;;  %v634_v20 = vpop.f32.mrf.mxu1 }
 0x142   : > { %v928_v19 = vadd.f32 %v2526_v3, %v527_v11  ;;  %v930_v28 = vadd.f32 %v2526_v3, %v634_v20  ;;  %v975_v34 = vmax.f32 %v927_v7, 0.0  ;;  %v977_v25 = vmax.f32 %v929_v15, 0.0 }
 0x143   : > { %v938_v7 = vmax.f32 %v890_v56, 0.0 }
 0x144   : > { %v976_v23 = vmax.f32 %v928_v19, 0.0  ;;  %v2543_v32 = vpop.f32.mrf.mxu0  ;;  %v978_v35 = vmax.f32 %v930_v28, 0.0  ;;  %v2547_v37 = vpop.f32.mrf.mxu1  ;;  %v937_v19 = vmax.f32 %v889_v54, 0.0 }
 0x146   : > { %v2553_v29 = vpop.f32.mrf.mxu0  ;;  %1007 = vmatprep.subr.mxu0 %v976_v23  ;;  %v2557_v41 = vpop.f32.mrf.mxu1  ;;  %1078 = vmatprep.subr.mxu1 %v978_v35 }
 0x147   : > { %1008 = vmatpush1.msra.mxu0 %v975_v34  ;;  %1079 = vmatpush1.msra.mxu1 %v977_v25 }
 0x148   : > { %1009 = vmatprep.subr.mxu0 %v968_v22  ;;  %1080 = vmatprep.subr.mxu1 %v970_v40 }
 0x149   : > { %1010 = vmatpush1.msra.mxu0 %v967_v39  ;;  %1081 = vmatpush1.msra.mxu1 %v969_v47 }
 0x14a   : > { %v2568_v61 = vpop.f32.mrf.mxu0  ;;  %1011 = vmatprep.subr.mxu0 %v960_v46  ;;  %v2574_v1 = vpop.f32.mrf.mxu1  ;;  %1082 = vmatprep.subr.mxu1 %v962_v49 }
 0x14b   : > { %1012 = vmatpush1.msra.mxu0 %v959_v27  ;;  %1083 = vmatpush1.msra.mxu1 %v961_v55 }
 0x14c   : > { %v2578_v6 = vpop.f32.mrf.mxu0  ;;  %1013 = vmatprep.subr.mxu0 %v952_v60  ;;  %v2582_v52 = vpop.f32.mrf.mxu1  ;;  %1084 = vmatprep.subr.mxu1 %v954_v63 }
 0x14d   : > { %1014 = vmatpush1.msra.mxu0 %v951_v62  ;;  %1085 = vmatpush1.msra.mxu1 %v953_v5 }
 0x14e   : > { %v2584_v4 = vpop.f32.mrf.mxu0  ;;  %1015 = vmatprep.subr.mxu0 %v944_v53  ;;  %v2586_v11 = vpop.f32.mrf.mxu1  ;;  %1086 = vmatprep.subr.mxu1 %v946_v9 }
 0x14f   : > { %1016 = vmatpush1.msra.mxu0 %v943_v10  ;;  %1087 = vmatpush1.msra.mxu1 %v945_v45 }
 0x150   : > { %v717_v15 = vpop.f32.mrf.mxu0  ;;  %1017 = vmatprep.subr.mxu0 %v936_v12  ;;  %v824_v20 = vpop.f32.mrf.mxu1  ;;  %1088 = vmatprep.subr.mxu1 %v938_v7 }
 0x151   : > { %1018 = vmatpush1.msra.mxu0 %v935_v14  ;;  %1089 = vmatpush1.msra.mxu1 %v937_v19  ;;  %v900_v5 = vadd.f32 %v2549_v16, %v717_v15  ;;  %v902_v12 = vadd.f32 %v2549_v16, %v824_v20  ;;  %v892_v14 = vadd.f32 %v2559_v42, %v2578_v6 }
 0x152   : > { %v721_v17 = vpop.f32.mrf.mxu0  ;;  %1681 = vmatmul.mubr.msk.f32.vlgmr.msra.gmra.mxu0 %vm983_vm1, %v2591_v50  ;;  %v828_v24 = vpop.f32.mrf.mxu1  ;;  %1682 = vmatmul.mubr.msk.f32.vlgmr.msra.gmra.mxu1 %vm983_vm1, %v2591_v50  ;;  %v901_v15 = vadd.f32 %v2549_v16, %v2586_v11  ;;  %v893_v6 = vadd.f32 %v2559_v42, %v2574_v1 }
 0x153   : > { %1193 = vmatprep.mubr.f32.mxu0 %v1922_v0  ;;  %1264 = vmatprep.mubr.f32.mxu1 %v1922_v0  ;;  %v909_v54 = vadd.f32 %v2533_v13, %v828_v24  ;;  %v950_v11 = vmax.f32 %v902_v12, 0.0 }
 0x154   : > { %v723_v28 = vpop.f32.mrf.mxu0  ;;  %v830_v21 = vpop.f32.mrf.mxu1 }
 0x155   : > { %v908_v58 = vadd.f32 %v2533_v13, %v723_v28  ;;  %v910_v51 = vadd.f32 %v2533_v13, %v830_v21  ;;  %v948_v28 = vmax.f32 %v900_v5, 0.0  ;;  %v957_v21 = vmax.f32 %v909_v54, 0.0 }
 0x156   : > { %v727_v31 = vpop.f32.mrf.mxu0  ;;  %v834_v23 = vpop.f32.mrf.mxu1 }
 0x157   : > { %v915_v57 = vadd.f32 %v2528_v8, %v727_v31  ;;  %v917_v56 = vadd.f32 %v2528_v8, %v834_v23  ;;  %v958_v24 = vmax.f32 %v910_v51, 0.0  ;;  %v940_v31 = vmax.f32 %v892_v14, 0.0 }
 0x158   : > { %v729_v26 = vpop.f32.mrf.mxu0  ;;  %v836_v30 = vpop.f32.mrf.mxu1 }
 0x159   : > { %v916_v48 = vadd.f32 %v2528_v8, %v729_v26  ;;  %v918_v59 = vadd.f32 %v2528_v8, %v836_v30  ;;  %v899_v8 = vadd.f32 %v2549_v16, %v2584_v4  ;;  %v963_v45 = vmax.f32 %v915_v57, 0.0 }
 0x15a   : > { %v733_v34 = vpop.f32.mrf.mxu0  ;;  %v840_v35 = vpop.f32.mrf.mxu1  ;;  %v965_v19 = vmax.f32 %v917_v56, 0.0  ;;  %v894_v4 = vadd.f32 %v2559_v42, %v2582_v52  ;;  %v941_v26 = vmax.f32 %v893_v6, 0.0 }
 0x15b   : > { %v923_v44 = vadd.f32 %v2530_v2, %v733_v34  ;;  %v925_v27 = vadd.f32 %v2530_v2, %v840_v35  ;;  %v964_v9 = vmax.f32 %v916_v48, 0.0  ;;  %v966_v7 = vmax.f32 %v918_v59, 0.0 }
 0x15c   : > { %v735_v38 = vpop.f32.mrf.mxu0  ;;  %v842_v18 = vpop.f32.mrf.mxu1  ;;  %v947_v16 = vmax.f32 %v899_v8, 0.0  ;;  %v942_v23 = vmax.f32 %v894_v4, 0.0 }
 0x15d   : > { %v924_v39 = vadd.f32 %v2530_v2, %v735_v38  ;;  %v926_v46 = vadd.f32 %v2530_v2, %v842_v18  ;;  %v971_v53 = vmax.f32 %v923_v44, 0.0  ;;  %v973_v10 = vmax.f32 %v925_v27, 0.0 }
 0x15e   : > { %v739_v22 = vpop.f32.mrf.mxu0  ;;  %v846_v25 = vpop.f32.mrf.mxu1 }
 0x15f   : > { %v931_v33 = vadd.f32 %v2526_v3, %v739_v22  ;;  %v933_v40 = vadd.f32 %v2526_v3, %v846_v25  ;;  %v972_v62 = vmax.f32 %v924_v39, 0.0  ;;  %v974_v2 = vmax.f32 %v926_v46, 0.0 }
 0x160   : > { %v741_v36 = vpop.f32.mrf.mxu0  ;;  %v848_v43 = vpop.f32.mrf.mxu1 }
 0x161   : > { %v932_v0 = vadd.f32 %v2526_v3, %v741_v36  ;;  %v934_v47 = vadd.f32 %v2526_v3, %v848_v43  ;;  %v979_v60 = vmax.f32 %v931_v33, 0.0  ;;  %v981_v63 = vmax.f32 %v933_v40, 0.0 }
 0x162   : > { %v907_v3 = vadd.f32 %v2533_v13, %v721_v17  ;;  %v956_v13 = vmax.f32 %v908_v58, 0.0  ;;  %v891_v17 = vadd.f32 %v2559_v42, %v2568_v61  ;;  %v949_v61 = vmax.f32 %v901_v15, 0.0  ;;  %v2633_v42 = vpop.f32.mrf.mxu0  ;;  %v2635_v1 = vpop.f32.mrf.mxu1 }
 0x163   : > { %v980_v49 = vmax.f32 %v932_v0, 0.0  ;;  %v982_v55 = vmax.f32 %v934_v47, 0.0 }
 0x164   : > { %v955_v20 = vmax.f32 %v907_v3, 0.0  ;;  %v939_v52 = vmax.f32 %v891_v17, 0.0  ;;  %v2637_v30 = vpop.f32.mrf.mxu0  ;;  %v2639_v34 = vpop.f32.mrf.mxu1 }
 0x165   : > { %1149 = vmatprep.subr.mxu0 %v980_v49  ;;  %1220 = vmatprep.subr.mxu1 %v982_v55 }
 0x166   : > { %1150 = vmatpush1.msra.mxu0 %v979_v60  ;;  %1221 = vmatpush1.msra.mxu1 %v981_v63 }
 0x167   : > { %1151 = vmatprep.subr.mxu0 %v972_v62  ;;  %1222 = vmatprep.subr.mxu1 %v974_v2 }
 0x168   : > { %1152 = vmatpush1.msra.mxu0 %v971_v53  ;;  %1223 = vmatpush1.msra.mxu1 %v973_v10 }
 0x169   : > { %1153 = vmatprep.subr.mxu0 %v964_v9  ;;  %1224 = vmatprep.subr.mxu1 %v966_v7 }
 0x16a   : > { %1154 = vmatpush1.msra.mxu0 %v963_v45  ;;  %1225 = vmatpush1.msra.mxu1 %v965_v19 }
 0x16b   : > { %1155 = vmatprep.subr.mxu0 %v956_v13  ;;  %1226 = vmatprep.subr.mxu1 %v958_v24 }
 0x16c   : > { %1156 = vmatpush1.msra.mxu0 %v955_v20  ;;  %1227 = vmatpush1.msra.mxu1 %v957_v21 }
 0x16d   : > { %1157 = vmatprep.subr.mxu0 %v948_v28  ;;  %1228 = vmatprep.subr.mxu1 %v950_v11 }
 0x16e   : > { %1158 = vmatpush1.msra.mxu0 %v947_v16  ;;  %1229 = vmatpush1.msra.mxu1 %v949_v61 }
 0x16f   : > { %1159 = vmatprep.subr.mxu0 %v940_v31  ;;  %1230 = vmatprep.subr.mxu1 %v942_v23 }
 0x170   : > { %1160 = vmatpush1.msra.mxu0 %v939_v52  ;;  %1231 = vmatpush1.msra.mxu1 %v941_v26 }
 0x171   : > { %1683 = vmatmul.mubr.msk.f32.vlgmr.msra.gmra.mxu0 %vm983_vm1, %v2591_v50  ;;  %1684 = vmatmul.mubr.msk.f32.vlgmr.msra.gmra.mxu1 %vm983_vm1, %v2591_v50 }
 0x212   : > { %v1053_v35 = vpop.f32.mrf.mxu0  ;;  %v1124_v18 = vpop.f32.mrf.mxu1 }
 0x213   : > { %v1272_v38 = vsel %vm1271_vm2, %v1053_v35, -inf  ;;  %v1286_v25 = vsel %vm1271_vm2, %v1124_v18, -inf }
 0x214   : > { %v1273_v22 = vrot.slane %v1272_v38, 4  ;;  %v1055_v33 = vpop.f32.mrf.mxu0  ;;  %v1126_v50 = vpop.f32.mrf.mxu1  ;;  %v1287_v39 = vrot.slane %v1286_v25, 4 }
 0x215   : > { %v1279_v36 = vsel %vm1271_vm2, %v1055_v33, -inf  ;;  %v1293_v40 = vsel %vm1271_vm2, %v1126_v50, -inf }
 0x216   : > { %v1274_v0 = vmax.f32 %v1272_v38, %v1273_v22  ;;  %v1280_v43 = vrot.slane %v1279_v36, 4  ;;  %v1294_v44 = vrot.slane %v1293_v40, 4  ;;  %v1288_v46 = vmax.f32 %v1286_v25, %v1287_v39 }
 0x218   : > { %v1275_v47 = vrot.slane %v1274_v0, 2  ;;  %v1281_v48 = vmax.f32 %v1279_v36, %v1280_v43  ;;  %v1295_v27 = vmax.f32 %v1293_v40, %v1294_v44  ;;  %v1289_v49 = vrot.slane %v1288_v46, 2 }
 0x21a   : > { %v1276_v57 = vmax.f32 %v1274_v0, %v1275_v47  ;;  %v1282_v59 = vrot.slane %v1281_v48, 2  ;;  %v1296_v60 = vrot.slane %v1295_v27, 2  ;;  %v1290_v55 = vmax.f32 %v1288_v46, %v1289_v49 }
 0x21c   : > { %v1277_v58 = vrot.slane %v1276_v57, 1  ;;  %v1283_v56 = vmax.f32 %v1281_v48, %v1282_v59  ;;  %v1297_v62 = vmax.f32 %v1295_v27, %v1296_v60  ;;  %v1291_v63 = vrot.slane %v1290_v55, 1 }
 0x21e   : > { %v1278_v3 = vmax.f32 %v1276_v57, %v1277_v58  ;;  %v1284_v51 = vrot.slane %v1283_v56, 1  ;;  %v1298_v53 = vrot.slane %v1297_v62, 1  ;;  %v1292_v2 = vmax.f32 %v1290_v55, %v1291_v63 }
 0x220   : > { %v1328_v5 = vsub.f32 %v1053_v35, %v1278_v3  ;;  %v1285_v54 = vmax.f32 %v1283_v56, %v1284_v51  ;;  %v1299_v9 = vmax.f32 %v1297_v62, %v1298_v53  ;;  %v1330_v10 = vsub.f32 %v1124_v18, %v1292_v2 }
 0x222   : > { %v1336_v8 = vmul.f32 1.442695, %v1328_v5  ;;  %v1329_v12 = vsub.f32 %v1055_v33, %v1285_v54  ;;  %v1331_v45 = vsub.f32 %v1126_v50, %v1299_v9  ;;  %v1340_v7 = vmul.f32 1.442695, %v1330_v10 }
 0x224   : > { %1759 = vpow2.f32 %v1336_v8  ;;  %v1338_v14 = vmul.f32 1.442695, %v1329_v12  ;;  %v1342_v15 = vmul.f32 1.442695, %v1331_v45 }
 0x225   : > { %1761 = vpow2.f32 %v1340_v7 }
 0x226   : > { %1763 = vpow2.f32 %v1338_v14 }
 0x227   : > { %1765 = vpow2.f32 %v1342_v15 }
 0x231   : > { %v1195_v13 = vpop.f32.mrf.mxu0  ;;  %v1266_v4 = vpop.f32.mrf.mxu1 }
 0x232   : > { %v1300_v19 = vsel %vm1271_vm2, %v1195_v13, -inf  ;;  %v1760_v28 = vpop.eup %1759  ;;  %v1314_v21 = vsel %vm1271_vm2, %v1266_v4, -inf }
 0x233   : > { %v1301_v17 = vrot.slane %v1300_v19, 4  ;;  %v1197_v20 = vpop.f32.mrf.mxu0  ;;  %v1268_v6 = vpop.f32.mrf.mxu1  ;;  %v1315_v11 = vrot.slane %v1314_v21, 4  ;;  %v1352_v26 = vsel %vm1271_vm2, %v1760_v28, 0.0 }
 0x234   : > { %v1307_v31 = vsel %vm1271_vm2, %v1197_v20, -inf  ;;  %v1321_v52 = vsel %vm1271_vm2, %v1268_v6, -inf  ;;  %v1762_v23 = vpop.eup %1761  ;;  %v1353_v40 = vrot.slane %v1352_v26, 4 }
 0x235   : > { %v1302_v24 = vmax.f32 %v1300_v19, %v1301_v17  ;;  %v1308_v61 = vrot.slane %v1307_v31, 4  ;;  %v1316_v38 = vmax.f32 %v1314_v21, %v1315_v11  ;;  %v1322_v18 = vrot.slane %v1321_v52, 4  ;;  %v1764_v22 = vpop.eup %1763 }
 0x236   : > { %v1766_v39 = vpop.eup %1765  ;;  %v1366_v0 = vsel %vm1271_vm2, %v1762_v23, 0.0  ;;  %v1359_v44 = vsel %vm1271_vm2, %v1764_v22, 0.0  ;;  %v1354_v62 = vadd.f32 %v1353_v40, %v1352_v26  ;;  %v1409_v45 = vmul.f32 %v1764_v22, %v2553_v29 }
 0x237   : > { %v1303_v16 = vrot.slane %v1302_v24, 2  ;;  %v1309_v25 = vmax.f32 %v1307_v31, %v1308_v61  ;;  %v1317_v36 = vrot.slane %v1316_v38, 2  ;;  %v1323_v50 = vmax.f32 %v1321_v52, %v1322_v18 }
 0x238   : > { %v1373_v49 = vsel %vm1271_vm2, %v1766_v39, 0.0  ;;  %v1367_v55 = vrot.slane %v1366_v0, 4  ;;  %v1360_v58 = vrot.slane %v1359_v44, 4  ;;  %v1355_v12 = vrot.slane %v1354_v62, 2 }
 0x239   : > { %v1304_v35 = vmax.f32 %v1302_v24, %v1303_v16  ;;  %v1310_v43 = vrot.slane %v1309_v25, 2  ;;  %v1318_v47 = vmax.f32 %v1316_v38, %v1317_v36  ;;  %v1324_v48 = vrot.slane %v1323_v50, 2 }
 0x23a   : > { %v1374_v53 = vrot.slane %v1373_v49, 4  ;;  %v1368_v9 = vadd.f32 %v1367_v55, %v1366_v0  ;;  %v1361_v10 = vadd.f32 %v1360_v58, %v1359_v44  ;;  %v1408_v19 = vmul.f32 %v1760_v28, %v2543_v32 }
 0x23b   : > { %v1305_v33 = vrot.slane %v1304_v35, 1  ;;  %v1311_v27 = vmax.f32 %v1309_v25, %v1310_v43  ;;  %v1319_v59 = vrot.slane %v1318_v47, 1  ;;  %v1325_v60 = vmax.f32 %v1323_v50, %v1324_v48 }
 0x23c   : > { %v1375_v15 = vadd.f32 %v1374_v53, %v1373_v49  ;;  %v1369_v24 = vrot.slane %v1368_v9, 2  ;;  %v1410_v21 = vmul.f32 %v1762_v23, %v2547_v37  ;;  %v1362_v16 = vrot.slane %v1361_v10, 2 }
 0x23d   : > { %v1306_v46 = vmax.f32 %v1304_v35, %v1305_v33  ;;  %v1312_v56 = vrot.slane %v1311_v27, 1  ;;  %v1320_v3 = vmax.f32 %v1318_v47, %v1319_v59  ;;  %v1326_v51 = vrot.slane %v1325_v60, 1 }
 0x23e   : > { %v1423_v11 = vsel %vm1271_vm2, %v1409_v45, 0.0  ;;  %v1411_v29 = vmul.f32 %v1766_v39, %v2557_v41  ;;  %v1370_v31 = vadd.f32 %v1369_v24, %v1368_v9  ;;  %v1430_v61 = vsel %vm1271_vm2, %v1410_v21, 0.0 }
 0x23f   : > { %v1332_v57 = vsub.f32 %v1195_v13, %v1306_v46  ;;  %v1313_v2 = vmax.f32 %v1311_v27, %v1312_v56  ;;  %v1334_v5 = vsub.f32 %v1266_v4, %v1320_v3  ;;  %v1327_v54 = vmax.f32 %v1325_v60, %v1326_v51 }
 0x240   : > { %v1356_v4 = vadd.f32 %v1355_v12, %v1354_v62  ;;  %v1363_v32 = vadd.f32 %v1362_v16, %v1361_v10  ;;  %v1424_v28 = vrot.slane %v1423_v11, 4  ;;  %v1437_v37 = vsel %vm1271_vm2, %v1411_v29, 0.0 }
 0x241   : > { %v1344_v63 = vmul.f32 1.442695, %v1332_v57  ;;  %v1333_v8 = vsub.f32 %v1197_v20, %v1313_v2  ;;  %v1348_v7 = vmul.f32 1.442695, %v1334_v5  ;;  %v1335_v14 = vsub.f32 %v1268_v6, %v1327_v54 }
 0x242   : > { %v1376_v20 = vrot.slane %v1375_v15, 2  ;;  %v1416_v6 = vsel %vm1271_vm2, %v1408_v19, 0.0  ;;  %v1357_v52 = vrot.slane %v1356_v4, 1  ;;  %v1431_v35 = vrot.slane %v1430_v61, 4 }
 0x243   : > { %1767 = vpow2.f32 %v1344_v63  ;;  %v1346_v13 = vmul.f32 1.442695, %v1333_v8  ;;  %v1350_v17 = vmul.f32 1.442695, %v1335_v14  ;;  %v1417_v23 = vrot.slane %v1416_v6, 4 }
 0x244   : > { %1769 = vpow2.f32 %v1348_v7  ;;  %v1377_v26 = vadd.f32 %v1376_v20, %v1375_v15  ;;  %v1371_v18 = vrot.slane %v1370_v31, 1  ;;  %v1364_v22 = vrot.slane %v1363_v32, 1 }
 0x245   : > { %1771 = vpow2.f32 %v1346_v13  ;;  %v1425_v25 = vadd.f32 %v1424_v28, %v1423_v11  ;;  %v1358_v33 = vadd.f32 %v1357_v52, %v1356_v4  ;;  %v1438_v36 = vrot.slane %v1437_v37, 4 }
 0x246   : > { %1773 = vpow2.f32 %v1350_v17  ;;  %v1378_v50 = vrot.slane %v1377_v26, 1  ;;  %v1418_v40 = vadd.f32 %v1417_v23, %v1416_v6  ;;  %v1432_v0 = vadd.f32 %v1431_v35, %v1430_v61 }
 0x247   : > { %v1372_v46 = vadd.f32 %v1371_v18, %v1370_v31  ;;  %v1365_v47 = vadd.f32 %v1364_v22, %v1363_v32  ;;  %v1426_v48 = vrot.slane %v1425_v25, 2  ;;  %1775 = vrcp.f32 %v1358_v33 }
 0x248   : > { %v1439_v57 = vadd.f32 %v1438_v36, %v1437_v37  ;;  %v1379_v58 = vadd.f32 %v1378_v50, %v1377_v26  ;;  %v1419_v20 = vrot.slane %v1418_v40, 2  ;;  %v1433_v29 = vrot.slane %v1432_v0, 2 }
 0x249   : > { %1777 = vrcp.f32 %v1365_v47  ;;  %v1427_v28 = vadd.f32 %v1426_v48, %v1425_v25  ;;  %v1924_v48 = vmov 1966171168  }
 0x24a   : > { %1779 = vrcp.f32 %v1379_v58  ;;  %v1440_v19 = vrot.slane %v1439_v57, 2  ;;  %v1420_v22 = vadd.f32 %v1419_v20, %v1418_v40  ;;  %v1434_v33 = vadd.f32 %v1433_v29, %v1432_v0 }
 0x24b   : > { %1781 = vrcp.f32 %v1372_v46 }
 0x24c   : > { %v1441_v52 = vadd.f32 %v1440_v19, %v1439_v57  ;;  %v1421_v47 = vrot.slane %v1420_v22, 1 }
 0x250   : > { %v1768_v38 = vpop.eup %1767 }
 0x251   : > { %v1380_v41 = vsel %vm1271_vm2, %v1768_v38, 0.0  ;;  %v1412_v43 = vmul.f32 %v1768_v38, %v2633_v42  ;;  %v1770_v44 = vpop.eup %1769 }
 0x252   : > { %v1381_v39 = vrot.slane %v1380_v41, 4  ;;  %v1772_v49 = vpop.eup %1771  ;;  %v1394_v59 = vsel %vm1271_vm2, %v1770_v44, 0.0  ;;  %v1414_v60 = vmul.f32 %v1770_v44, %v2635_v1  ;;  %v1442_v44 = vrot.slane %v1441_v52, 1 }
 0x253   : > { %v1774_v55 = vpop.eup %1773  ;;  %v1395_v62 = vrot.slane %v1394_v59, 4  ;;  %v1387_v63 = vsel %vm1271_vm2, %v1772_v49, 0.0  ;;  %v1444_v42 = vsel %vm1271_vm2, %v1412_v43, 0.0  ;;  %v1413_v51 = vmul.f32 %v1772_v49, %v2637_v30 }
 0x254   : > { %v1382_v27 = vadd.f32 %v1381_v39, %v1380_v41  ;;  %v1388_v3 = vrot.slane %v1387_v63, 4  ;;  %v1401_v53 = vsel %vm1271_vm2, %v1774_v55, 0.0  ;;  %v1458_v54 = vsel %vm1271_vm2, %v1414_v60, 0.0  ;;  %v1776_v18 = vpop.eup %1775 }
 0x255   : > { %v1396_v5 = vadd.f32 %v1395_v62, %v1394_v59  ;;  %v1451_v1 = vsel %vm1271_vm2, %v1413_v51, 0.0  ;;  %v1402_v10 = vrot.slane %v1401_v53, 4  ;;  %v1415_v8 = vmul.f32 %v1774_v55, %v2639_v34 }
 0x256   : > { %v1383_v56 = vrot.slane %v1382_v27, 2  ;;  %v1389_v9 = vadd.f32 %v1388_v3, %v1387_v63  ;;  %v1445_v45 = vrot.slane %v1444_v42, 4  ;;  %v1452_v15 = vrot.slane %v1451_v1, 4  ;;  %v1778_v43 = vpop.eup %1777 }
 0x257   : > { %v1397_v7 = vrot.slane %v1396_v5, 2  ;;  %v1403_v30 = vadd.f32 %v1402_v10, %v1401_v53  ;;  %v1465_v13 = vsel %vm1271_vm2, %v1415_v8, 0.0  ;;  %v1459_v24 = vrot.slane %v1458_v54, 4  ;;  %v1780_v57 = vpop.eup %1779 }
 0x258   : > { %v1384_v2 = vadd.f32 %v1383_v56, %v1382_v27  ;;  %v1390_v14 = vrot.slane %v1389_v9, 2  ;;  %v1466_v11 = vrot.slane %v1465_v13, 4  ;;  %v1446_v6 = vadd.f32 %v1445_v45, %v1444_v42  ;;  %v1782_v55 = vpop.eup %1781 }
 0x259   : > { %v1398_v17 = vadd.f32 %v1397_v7, %v1396_v5  ;;  %v1404_v4 = vrot.slane %v1403_v30, 2  ;;  %v1453_v61 = vadd.f32 %v1452_v15, %v1451_v1  ;;  %v1460_v37 = vadd.f32 %v1459_v24, %v1458_v54 }
 0x25a   : > { %v1385_v12 = vrot.slane %v1384_v2, 1  ;;  %v1391_v16 = vadd.f32 %v1390_v14, %v1389_v9  ;;  %v1467_v38 = vadd.f32 %v1466_v11, %v1465_v13  ;;  %v1447_v36 = vrot.slane %v1446_v6, 2 }
 0x25b   : > { %v1399_v34 = vrot.slane %v1398_v17, 1  ;;  %v1405_v32 = vadd.f32 %v1404_v4, %v1403_v30  ;;  %v1454_v41 = vrot.slane %v1453_v61, 2  ;;  %v1428_v39 = vrot.slane %v1427_v28, 1 }
 0x25c   : > { %v1386_v21 = vadd.f32 %v1385_v12, %v1384_v2  ;;  %v1392_v31 = vrot.slane %v1391_v16, 1  ;;  %v1461_v46 = vrot.slane %v1460_v37, 2  ;;  %v1468_v25 = vrot.slane %v1467_v38, 2 }
 0x25d   : > { %v1400_v26 = vadd.f32 %v1399_v34, %v1398_v17  ;;  %v1406_v35 = vrot.slane %v1405_v32, 1  ;;  %v1501_v27 = vunpack.c.l.s4 %v1924_v48  ;;  %v1503_v49 = vlaneseq }
 0x25e   : > { %1783 = vrcp.f32 %v1386_v21  ;;  %v1393_v23 = vadd.f32 %v1392_v31, %v1391_v16  ;;  %v1435_v59 = vrot.slane %v1434_v33, 1  ;;  %v1448_v60 = vadd.f32 %v1447_v36, %v1446_v6 }
 0x25f   : > { %1785 = vrcp.f32 %v1400_v26  ;;  %v1407_v50 = vadd.f32 %v1406_v35, %v1405_v32  ;;  %v1455_v40 = vadd.f32 %v1454_v41, %v1453_v61  ;;  %v1429_v0 = vadd.f32 %v1428_v39, %v1427_v28 }
 0x260   : > { %1787 = vrcp.f32 %v1393_v23  ;;  %v1462_v58 = vadd.f32 %v1461_v46, %v1460_v37  ;;  %v1469_v56 = vadd.f32 %v1468_v25, %v1467_v38  ;;  %v1443_v62 = vadd.f32 %v1442_v44, %v1441_v52 }
 0x261   : > { %1789 = vrcp.f32 %v1407_v50  ;;  %v1422_v63 = vadd.f32 %v1421_v47, %v1420_v22  ;;  %v1481_v42 = vmul.f32 %v1778_v43, %v1429_v0  ;;  %v1502_v3 = vunpack.c.0.s8 %v1501_v27 }
 0x262   : > { %v1504_v51 = vshrl.u32 %v1503_v49, 7  ;;  %v1449_v53 = vrot.slane %v1448_v60, 1  ;;  %v1456_v2 = vrot.slane %v1455_v40, 1  ;;  %v1436_v5 = vadd.f32 %v1435_v59, %v1434_v33 }
 0x263   : > { %v1483_v54 = vmul.f32 %v1780_v57, %v1443_v62  ;;  %v1480_v9 = vmul.f32 %v1776_v18, %v1422_v63  ;;  %v1463_v1 = vrot.slane %v1462_v58, 1  ;;  %v1470_v10 = vrot.slane %v1469_v56, 1 }
 0x264   : > { %v1482_v8 = vmul.f32 %v1782_v55, %v1436_v5  ;;  %v1505_v7 = vsub.s32 %v1502_v3, %v1504_v51  ;;  %v1450_v15 = vadd.f32 %v1449_v53, %v1448_v60  ;;  %v1457_v30 = vadd.f32 %v1456_v2, %v1455_v40 }
 0x265   : > { %v1496_v45 = vcombine.low %v1480_v9, %v1481_v42  ;;  %v1464_v17 = vadd.f32 %v1463_v1, %v1462_v58  ;;  %v1471_v24 = vadd.f32 %v1470_v10, %v1469_v56 }
 0x266   : > { %v1497_v13 = vcombine.low %v1482_v8, %v1483_v54 }
 0x267   : > { %v1506_v11 = vrot.slane %v1496_v45, %v1505_v7 }
 0x268   : > { %v1513_v6 = vrot.slane %v1497_v13, %v1505_v7 }
 0x26a   : > { %v1528_v28 = vcombine.low %v1506_v11, %v1513_v6 }
 0x26b   : > { %v1784_v12 = vpop.eup %1783 }
 0x26c   : > { %v1786_v14 = vpop.eup %1785  ;;  %v1484_v21 = vmul.f32 %v1784_v12, %v1450_v15  ;;  %v1536_v26 = vrot.slane %v1528_v28, %v1505_v7 }
 0x26d   : > { %v1788_v19 = vpop.eup %1787  ;;  %v1486_v20 = vmul.f32 %v1786_v14, %v1464_v17 }
 0x26e   : > { %v1485_v16 = vmul.f32 %v1788_v19, %v1457_v30  ;;  %v1790_v4 = vpop.eup %1789 }
 0x26f   : > { %v1487_v29 = vmul.f32 %v1790_v4, %v1471_v24 }
 0x270   : > { %v1498_v34 = vcombine.low %v1484_v21, %v1485_v16 }
 0x271   : > { %v1499_v31 = vcombine.low %v1486_v20, %v1487_v29 }
 0x272   : > { %v1520_v61 = vrot.slane %v1498_v34, %v1505_v7 }
 0x273   : > { %v1527_v32 = vrot.slane %v1499_v31, %v1505_v7 }
 0x275   : > { %v1529_v52 = vcombine.low %v1520_v61, %v1527_v32 }
 0x277   : > { %v1543_v37 = vrot.slane %v1529_v52, %v1505_v7 }
 0x279   : > { %v1544_v23 = vcombine.low %v1536_v26, %v1543_v37 }
 0x27b   : > { %1546 = vst [vmem:[%s230_s26] sm:$0xff] %v1544_v23 }
 0x27c   : > { %1858 = shalt.err (!%p1855_p10)
}
 0x27d   : > { %s1859_s23 = scalar_lea.hbm %s1560_s8, 128  ;;  %s1863_s5 = scalar_lea.hbm %s2713_s4, 256 }
 0x27e   : > { %p1860_p5 = scmp.ne.s32.totalorder %s1560_s8, %s1859_s23  ;;  %p1864_p4 = scmp.lt.s32.totalorder %s1560_s8, %s2713_s4 }
 0x27f   : > { %p1865_p0 = scmp.lt.s32.totalorder %s1863_s5, %s1859_s23 }
 0x280   : > { %p1861_p11 = pnand %p1860_p5, %p2729_p13 }
 0x281   : > { %p1866_p1 = por %p1865_p0, %p1864_p4 }
 0x282   : > { %p1862_p6 = pneg %p1861_p11 }
 0x284   : > { %p1867_p12 = pnand %p1866_p1, %p1862_p6 }
 0x286   : > { %1870 = shalt.err (!%p1867_p12)
}
 0x287   : > { %1698 = dma.vmem_to_hbm [thread:$0]  (%p2729_p13), %s1563_s29, 128, %s1560_s8, %s1548_s25  }
 0x288 PF: > { %s1574_s12 = sand.u32 1, %s1901_s15   ;;  %p2730_p2 = scmp.ne.s32.totalorder %s2721_s28, 0 }
 0x289   : > { %p2731_p3 = scmp.ge.s32.totalorder %s1913_s18, 2  ;;  %s1575_s20 = scalar_lea.sflag [#allocation4], %s1574_s12 }
 0x28b   : > { %p1709_p7 = pnand %p2731_p3, %p2730_p2 }
 0x28d   : > { %p1710_p8 = pneg %p1709_p7 }
 0x28f   : > { %1896 = dma.done.wait (%p1710_p8), %s1575_s20, 128  }
 0x290   : > { %1898 = vsyncadd (%p1710_p8), %s1575_s20, 4294967168  ;;  %p18_p9 = scmp.ge.s32.totalorder %s1976_s21, 4   ;;  %s2732_s15 = smov %s1905_s16 }
 0x291   : > { %s2733_s16 = smov %s1909_s17  ;;  %s2734_s17 = smov %s1988_s24 }
 0x292   : > { %s2735_s18 = smov %s1976_s21  ;;  %20 = sbr.rel (!%p18_p9) target bundleno = 6 (0x6), region = 85 }
 0x297   :  { %1580 = vsyncpa [#allocation3], 1 }
 0x298   :  { %1582 = vsyncpa [#allocation3 + $0x1], 1 }
 0x299   :  { %1583 = vsyncpa [#allocation6], 1 }
 0x29a   :  { %1584 = vsyncpa [#allocation4], 1 }
 0x29b   :  { %1586 = vsyncpa [#allocation4 + $0x1], 1 }

</bundles_post_ra>
